<compile_context>
chip_gen: v5e
topology: v5e:2x2
jax: 0.10.0
libtpu: 0.0.40
codegen_flags: <defaults>
</compile_context>

<pallas_src>
import jax
import jax.numpy as jnp
from jax.experimental import pallas as pl
from jax.experimental.pallas import tpu as pltpu


# ----------------------------------------------------------------------------- helpers
def _round_up(x, m):
    return ((x + m - 1) // m) * m


def _vmem_limit_bytes(TT, Bc, D, H, Op):
    """Estimate scoped-VMEM need: resident weights + streamed blocks + scratch."""
    G = 4 * H
    bf2, f4 = 2, 4
    weights = (D * G + 3 * H * G + H * Op) * bf2 + (2 * G + Op) * f4
    x_blk = 2 * TT * Bc * D * bf2          # double-buffered streamed input block
    xg = TT * Bc * G * f4                  # per-block pre-activation scratch
    state = 4 * Bc * H * f4                # h0, c0, h1, c1
    outb = 2 * Bc * Op * f4
    est = weights + x_blk + xg + state + outb
    return int(min(max(3 * est // 2 + (4 << 20), 16 << 20), 128 << 20))


# ----------------------------------------------------------------------------- kernel
def _make_lstm_kernel(T, TT, unroll):
    """Kernel closure over static time sizes (handles a ragged last block)."""
    ragged = (T % TT) != 0

    def kernel(x_ref, wih0_ref, b0_ref, whh0_ref, wih1_ref, whh1_ref, b1_ref,
               wlin_ref, blin_ref, out_ref,
               xg_ref, h0_ref, c0_ref, h1_ref, c1_ref):
        tb = pl.program_id(1)
        n_tb = pl.num_programs(1)
        Bc, H = h0_ref.shape
        G = 4 * H

        @pl.when(tb == 0)
        def _():
            h0_ref[...] = jnp.zeros_like(h0_ref)
            c0_ref[...] = jnp.zeros_like(c0_ref)
            h1_ref[...] = jnp.zeros_like(h1_ref)
            c1_ref[...] = jnp.zeros_like(c1_ref)

        # Layer-0 input projection for ALL TT steps of this block in one MXU
        # matmul (off the sequential path); layer-0 biases folded in.
        xg_ref[...] = (jnp.dot(x_ref[0, 0], wih0_ref[...],
                               preferred_element_type=jnp.float32)
                       + b0_ref[...])

        # Hoisted once per block: layer-1 fused bias broadcast.
        b1 = jnp.broadcast_to(b1_ref[...], (Bc, G))

        def gates_to_state(g, c):
            # Packed gates [i | f | g | o], each of natural width H.
            i_g = jax.nn.sigmoid(g[:, 0 * H:1 * H])
            f_g = jax.nn.sigmoid(g[:, 1 * H:2 * H])
            g_g = jnp.tanh(g[:, 2 * H:3 * H])
            o_g = jax.nn.sigmoid(g[:, 3 * H:4 * H])
            c_new = f_g * c + i_g * g_g
            return o_g * jnp.tanh(c_new), c_new

        def step(t, carry):
            h0, c0, h1, c1 = carry
            row = pl.multiple_of(t * Bc, Bc)
            # Layer 0: only the recurrent matmul sits on the sequential path.
            g0 = xg_ref[pl.ds(row, Bc), :] + jnp.dot(
                h0.astype(jnp.bfloat16), whh0_ref[...],
                preferred_element_type=jnp.float32)
            h0n, c0n = gates_to_state(g0, c0)
            # Layer 1: split matmuls; h1 @ W_hh1 only depends on h1(t-1) so it
            # can issue in parallel with the whole layer-0 cell above.
            g1 = (jnp.dot(h1.astype(jnp.bfloat16), whh1_ref[...],
                          preferred_element_type=jnp.float32)
                  + jnp.dot(h0n.astype(jnp.bfloat16), wih1_ref[...],
                            preferred_element_type=jnp.float32)
                  + b1)
            h1n, c1n = gates_to_state(g1, c1)
            if ragged:
                # Last block may contain padded (zero) time steps: keep state.
                valid = (tb * TT + t) < T
                h0n = jnp.where(valid, h0n, h0)
                c0n = jnp.where(valid, c0n, c0)
                h1n = jnp.where(valid, h1n, h1)
                c1n = jnp.where(valid, c1n, c1)
            return h0n, c0n, h1n, c1n

        h0, c0, h1, c1 = jax.lax.fori_loop(
            0, TT, step,
            (h0_ref[...], c0_ref[...], h1_ref[...], c1_ref[...]),
            unroll=unroll)

        h0_ref[...] = h0
        c0_ref[...] = c0
        h1_ref[...] = h1
        c1_ref[...] = c1

        # Linear head on the final top-layer hidden state only (lane-dense,
        # padded output; wrapper slices the valid rows / columns back out).
        @pl.when(tb == n_tb - 1)
        def _():
            out_ref[...] = (jnp.dot(h1.astype(jnp.bfloat16), wlin_ref[...],
                                    preferred_element_type=jnp.float32)
                            + blin_ref[...])

    return kernel


# ----------------------------------------------------------------------------- wrappers
def lstm_forward(x_tbd, params, *, max_block_t=16, unroll_cap=8):
    """x_tbd: (T, B, input_dim) float32.  Returns (Bp, Op) float32 (padded)."""
    T, B, D = x_tbd.shape
    H = params["whh0"].shape[0]
    G = 4 * H
    Op = params["wlin"].shape[1]

    Bp = _round_up(B, 8)                                   # dense sublanes
    n_bc = 2 if (Bp >= 16 and Bp % 16 == 0) else 1         # v7x: 2nd TC via parallel axis
    Bc = Bp // n_bc
    TT = min(T, max_block_t)                               # time steps per grid step
    n_tb = -(-T // TT)
    Tp = n_tb * TT

    x = jnp.pad(x_tbd.astype(jnp.bfloat16),
                ((0, Tp - T), (0, Bp - B), (0, 0)))
    # (Tp, Bp, D) -> (n_bc, n_tb, TT*Bc, D): each grid block is a dense 2-D slab.
    x = (x.reshape(n_tb, TT, n_bc, Bc, D)
          .transpose(2, 0, 1, 3, 4)
          .reshape(n_bc, n_tb, TT * Bc, D))

    kernel = _make_lstm_kernel(T=T, TT=TT, unroll=min(TT, unroll_cap))
    vmem_spec = pl.BlockSpec(memory_space=pltpu.MemorySpace.VMEM)

    return pl.pallas_call(
        kernel,
        out_shape=jax.ShapeDtypeStruct((Bp, Op), jnp.float32),
        grid_spec=pltpu.PrefetchScalarGridSpec(
            num_scalar_prefetch=0,
            grid=(n_bc, n_tb),
            in_specs=[
                pl.BlockSpec((1, 1, TT * Bc, D), lambda bc, tb: (bc, tb, 0, 0)),
                vmem_spec,   # W_ih layer 0      (D, 4H)  bf16, resident
                vmem_spec,   # fused bias l0     (1, 4H)  f32
                vmem_spec,   # W_hh layer 0      (H, 4H)  bf16, resident
                vmem_spec,   # W_ih layer 1      (H, 4H)  bf16, resident
                vmem_spec,   # W_hh layer 1      (H, 4H)  bf16, resident
                vmem_spec,   # fused bias l1     (1, 4H)  f32
                vmem_spec,   # linear W          (H, Op)  bf16
                vmem_spec,   # linear b          (1, Op)  f32
            ],
            out_specs=pl.BlockSpec((Bc, Op), lambda bc, tb: (bc, 0)),
            scratch_shapes=[
                pltpu.VMEM((TT * Bc, G), jnp.float32),   # block pre-activations
                pltpu.VMEM((Bc, H), jnp.float32),        # h0
                pltpu.VMEM((Bc, H), jnp.float32),        # c0
                pltpu.VMEM((Bc, H), jnp.float32),        # h1
                pltpu.VMEM((Bc, H), jnp.float32),        # c1
            ],
        ),
        compiler_params=pltpu.CompilerParams(
            dimension_semantics=("parallel", "arbitrary"),
            vmem_limit_bytes=_vmem_limit_bytes(TT, Bc, D, H, Op)),
    )(x, params["wih0"], params["b0"], params["whh0"], params["wih1"],
      params["whh1"], params["b1"], params["wlin"], params["blin"])


def lstm_module_forward(x_btchw, input_size, time_seq, params):
    """Mirrors LSTM.forward: batch-first 5D input (B, T, C, H, W), pca=False."""
    B = x_btchw.shape[0]
    out_dim = input_size[0] * input_size[1]
    # permute(1,0,2,3,4) then view(time_seq, B, -1)
    x = jnp.transpose(x_btchw, (1, 0, 2, 3, 4)).reshape(time_seq, B, -1)
    y = lstm_forward(x.astype(jnp.float32), params)   # (Bp, Op) padded
    y = y[:B, :out_dim]                               # drop batch/lane padding
    return y.reshape(B, 1, 1, input_size[0], input_size[1])


# ----------------------------------------------------------------------------- params
def init_raw_params(key, input_dim, hidden_dim):
    """PyTorch-layout weights (nn.LSTM / nn.Linear shapes), uniform +-1/sqrt(H)."""
    ks = jax.random.split(key, 10)
    s = 1.0 / jnp.sqrt(hidden_dim)
    u = lambda k, shape: jax.random.uniform(k, shape, jnp.float32, -s, s)
    H = hidden_dim
    return {
        "weight_ih_l0": u(ks[0], (4 * H, input_dim)),
        "weight_hh_l0": u(ks[1], (4 * H, H)),
        "bias_ih_l0":   u(ks[2], (4 * H,)),
        "bias_hh_l0":   u(ks[3], (4 * H,)),
        "weight_ih_l1": u(ks[4], (4 * H, H)),
        "weight_hh_l1": u(ks[5], (4 * H, H)),
        "bias_ih_l1":   u(ks[6], (4 * H,)),
        "bias_hh_l1":   u(ks[7], (4 * H,)),
        "linear_w":     u(ks[8], (input_dim, H)),
        "linear_b":     u(ks[9], (input_dim,)),
    }


def prepare_params(raw, hidden_dim, out_dim):
    """Transpose to (K, 4H) layout, fold biases, cast MXU operands to bf16.
    Gates stay packed at natural width 4H (no per-gate lane padding); only the
    Linear head's output dim is lane-padded for a dense final store."""
    Op = _round_up(out_dim, 128)
    f32, bf16 = jnp.float32, jnp.bfloat16
    wih0 = raw["weight_ih_l0"].T                                        # (D, 4H)
    whh0 = raw["weight_hh_l0"].T                                        # (H, 4H)
    b0 = (raw["bias_ih_l0"] + raw["bias_hh_l0"])[None, :]               # (1, 4H)
    wih1 = raw["weight_ih_l1"].T                                        # (H, 4H)
    whh1 = raw["weight_hh_l1"].T                                        # (H, 4H)
    b1 = (raw["bias_ih_l1"] + raw["bias_hh_l1"])[None, :]               # (1, 4H)
    wlin = jnp.pad(raw["linear_w"].T, ((0, 0), (0, Op - out_dim)))      # (H, Op)
    blin = jnp.pad(raw["linear_b"][None, :], ((0, 0), (0, Op - out_dim)))
    return {
        "wih0": wih0.astype(bf16), "b0": b0.astype(f32),
        "whh0": whh0.astype(bf16),
        "wih1": wih1.astype(bf16), "whh1": whh1.astype(bf16),
        "b1": b1.astype(f32),
        "wlin": wlin.astype(bf16), "blin": blin.astype(f32),
    }


# ----------------------------------------------------------------------------- reference
def _reference_forward(x_btchw, input_size, time_seq, raw, matmul_dtype=jnp.float32):
    """Pure-JAX reference of the 2-layer LSTM + Linear (PyTorch semantics).
    matmul_dtype lets us also build a bf16-matmul reference for a tight check."""
    B = x_btchw.shape[0]
    H = raw["weight_hh_l0"].shape[1]
    x = jnp.transpose(x_btchw, (1, 0, 2, 3, 4)).reshape(time_seq, B, -1).astype(jnp.float32)

    def mm(a, w):  # a @ w.T with f32 accumulation
        return jnp.dot(a.astype(matmul_dtype), w.T.astype(matmul_dtype),
                       preferred_element_type=jnp.float32)

    def cell(x_in, h, c, wih, whh, bih, bhh):
        g = mm(x_in, wih) + mm(h, whh) + bih + bhh
        i = jax.nn.sigmoid(g[:, 0 * H:1 * H])
        f = jax.nn.sigmoid(g[:, 1 * H:2 * H])
        gg = jnp.tanh(g[:, 2 * H:3 * H])
        o = jax.nn.sigmoid(g[:, 3 * H:4 * H])
        c_new = f * c + i * gg
        return o * jnp.tanh(c_new), c_new

    h0 = c0 = h1 = c1 = jnp.zeros((B, H), jnp.float32)
    for t in range(time_seq):
        h0, c0 = cell(x[t], h0, c0, raw["weight_ih_l0"], raw["weight_hh_l0"],
                      raw["bias_ih_l0"], raw["bias_hh_l0"])
        h1, c1 = cell(h0, h1, c1, raw["weight_ih_l1"], raw["weight_hh_l1"],
                      raw["bias_ih_l1"], raw["bias_hh_l1"])
    y = mm(h1, raw["linear_w"]) + raw["linear_b"]
    return y.reshape(B, 1, 1, input_size[0], input_size[1])


# ----------------------------------------------------------------------------- main
if __name__ == "__main__":
    # Shapes consistent with the module: input_size=(4,4) -> input_dim=16,
    # time_seq=8, hidden_dim=32, batch=2, channel dim = 1 (pca=False path).
    input_size = (4, 4)
    time_seq = 8
    hidden_dim = 32
    batch = 2
    input_dim = input_size[0] * input_size[1]

    key = jax.random.PRNGKey(0)
    kx, kp = jax.random.split(key)
    x = jax.random.normal(kx, (batch, time_seq, 1, input_size[0], input_size[1]),
                          dtype=jnp.float32)
    raw = init_raw_params(kp, input_dim, hidden_dim)
    params = prepare_params(raw, hidden_dim, input_dim)

    y = lstm_module_forward(x, input_size, time_seq, params)
    y = jax.block_until_ready(y)

    # Tight check against a reference that uses the same bf16 MXU operands,
    # and a (looser) check against the pure-f32 PyTorch-semantics reference.
    y_ref_bf16 = _reference_forward(x, input_size, time_seq, raw, jnp.bfloat16)
    y_ref_f32 = _reference_forward(x, input_size, time_seq, raw, jnp.float32)

    assert y.shape == (batch, 1, 1, input_size[0], input_size[1])
    assert jnp.allclose(y, y_ref_bf16, atol=5e-3, rtol=5e-3)
    assert jnp.allclose(y, y_ref_f32, atol=5e-2, rtol=5e-2)

    # TODO(synk): the PyTorch module also stashes the final (h, c) in self.hidden as a
    # side effect; the forward output does not depend on it so it is not returned here.

    print("KERNEL_OK")
</pallas_src>

<mosaic_0001>
module attributes {stable_mosaic.version = 11 : i64} {
  func.func @kernel(%arg0: i32, %arg1: i32, %arg2: memref<1x1x64x16xbf16, #tpu.memory_space<vmem>>, %arg3: memref<16x128xbf16, #tpu.memory_space<vmem>>, %arg4: memref<1x128xf32, #tpu.memory_space<vmem>>, %arg5: memref<32x128xbf16, #tpu.memory_space<vmem>>, %arg6: memref<32x128xbf16, #tpu.memory_space<vmem>>, %arg7: memref<32x128xbf16, #tpu.memory_space<vmem>>, %arg8: memref<1x128xf32, #tpu.memory_space<vmem>>, %arg9: memref<32x128xbf16, #tpu.memory_space<vmem>>, %arg10: memref<1x128xf32, #tpu.memory_space<vmem>>, %arg11: memref<8x128xf32, #tpu.memory_space<vmem>>, %arg12: memref<64x128xf32, #tpu.memory_space<vmem>>, %arg13: memref<8x32xf32, #tpu.memory_space<vmem>>, %arg14: memref<8x32xf32, #tpu.memory_space<vmem>>, %arg15: memref<8x32xf32, #tpu.memory_space<vmem>>, %arg16: memref<8x32xf32, #tpu.memory_space<vmem>>) attributes {dimension_semantics = [#tpu.dimension_semantics<parallel>, #tpu.dimension_semantics<arbitrary>], iteration_bounds = array<i64: 1, 1>, scalar_prefetch = 0 : i64, scratch_operands = 5 : i64, tpu.core_type = #tpu.core_type<tc>, window_params = [{transform_indices = @transform_0, window_bounds = array<i64: 1, 1, 64, 16>}, {pipeline_mode = #tpu.pipeline_mode<synchronous>, transform_indices = @transform_1, window_bounds = array<i64: 16, 128>}, {pipeline_mode = #tpu.pipeline_mode<synchronous>, transform_indices = @transform_2, window_bounds = array<i64: 1, 128>}, {pipeline_mode = #tpu.pipeline_mode<synchronous>, transform_indices = @transform_3, window_bounds = array<i64: 32, 128>}, {pipeline_mode = #tpu.pipeline_mode<synchronous>, transform_indices = @transform_4, window_bounds = array<i64: 32, 128>}, {pipeline_mode = #tpu.pipeline_mode<synchronous>, transform_indices = @transform_5, window_bounds = array<i64: 32, 128>}, {pipeline_mode = #tpu.pipeline_mode<synchronous>, transform_indices = @transform_6, window_bounds = array<i64: 1, 128>}, {pipeline_mode = #tpu.pipeline_mode<synchronous>, transform_indices = @transform_7, window_bounds = array<i64: 32, 128>}, {pipeline_mode = #tpu.pipeline_mode<synchronous>, transform_indices = @transform_8, window_bounds = array<i64: 1, 128>}, {transform_indices = @transform_9, window_bounds = array<i64: 8, 128>}]} {
    %c0_i32 = arith.constant 0 : i32
    %0 = arith.cmpi eq, %arg1, %c0_i32 : i32
    %1 = arith.extui %0 : i1 to i32
    %c0_i32_0 = arith.constant 0 : i32
    %2 = arith.cmpi ne, %1, %c0_i32_0 : i32
    scf.if %2 {
      %cst_167 = arith.constant 0.000000e+00 : f32
      %553 = vector.broadcast %cst_167 : f32 to vector<8x32xf32>
      %c0_168 = arith.constant 0 : index
      %c0_169 = arith.constant 0 : index
      %554 = vector.load %arg13[%c0_168, %c0_169] : memref<8x32xf32, #tpu.memory_space<vmem>>, vector<8x32xf32>
      tpu.vector_store %arg13[%c0_168, %c0_169], %553 {strides = array<i32>} : memref<8x32xf32, #tpu.memory_space<vmem>>, vector<8x32xf32>,
      %cst_170 = arith.constant 0.000000e+00 : f32
      %555 = vector.broadcast %cst_170 : f32 to vector<8x32xf32>
      %c0_171 = arith.constant 0 : index
      %c0_172 = arith.constant 0 : index
      %556 = vector.load %arg14[%c0_171, %c0_172] : memref<8x32xf32, #tpu.memory_space<vmem>>, vector<8x32xf32>
      tpu.vector_store %arg14[%c0_171, %c0_172], %555 {strides = array<i32>} : memref<8x32xf32, #tpu.memory_space<vmem>>, vector<8x32xf32>,
      %cst_173 = arith.constant 0.000000e+00 : f32
      %557 = vector.broadcast %cst_173 : f32 to vector<8x32xf32>
      %c0_174 = arith.constant 0 : index
      %c0_175 = arith.constant 0 : index
      %558 = vector.load %arg15[%c0_174, %c0_175] : memref<8x32xf32, #tpu.memory_space<vmem>>, vector<8x32xf32>
      tpu.vector_store %arg15[%c0_174, %c0_175], %557 {strides = array<i32>} : memref<8x32xf32, #tpu.memory_space<vmem>>, vector<8x32xf32>,
      %cst_176 = arith.constant 0.000000e+00 : f32
      %559 = vector.broadcast %cst_176 : f32 to vector<8x32xf32>
      %c0_177 = arith.constant 0 : index
      %c0_178 = arith.constant 0 : index
      %560 = vector.load %arg16[%c0_177, %c0_178] : memref<8x32xf32, #tpu.memory_space<vmem>>, vector<8x32xf32>
      tpu.vector_store %arg16[%c0_177, %c0_178], %559 {strides = array<i32>} : memref<8x32xf32, #tpu.memory_space<vmem>>, vector<8x32xf32>,
    } else {
    }
    %c0 = arith.constant 0 : index
    %c0_1 = arith.constant 0 : index
    %c0_2 = arith.constant 0 : index
    %c0_3 = arith.constant 0 : index
    %3 = vector.load %arg2[%c0, %c0_1, %c0_2, %c0_3] : memref<1x1x64x16xbf16, #tpu.memory_space<vmem>>, vector<1x1x64x16xbf16>
    %4 = vector.shape_cast %3 : vector<1x1x64x16xbf16> to vector<64x16xbf16>
    %c0_4 = arith.constant 0 : index
    %c0_5 = arith.constant 0 : index
    %5 = vector.load %arg3[%c0_4, %c0_5] : memref<16x128xbf16, #tpu.memory_space<vmem>>, vector<16x128xbf16>
    %cst = arith.constant dense<0.000000e+00> : vector<64x128xf32>
    %6 = tpu.matmul %4, %5, %cst {dimension_numbers = #tpu.dot_dimension_numbers<[1], [0], [0], [1], [0, 0, 1, 1], [], []>} : vector<64x16xbf16>, vector<16x128xbf16>, vector<64x128xf32> -> vector<64x128xf32>
    %c0_6 = arith.constant 0 : index
    %c0_7 = arith.constant 0 : index
    %7 = vector.load %arg4[%c0_6, %c0_7] : memref<1x128xf32, #tpu.memory_space<vmem>>, vector<1x128xf32>
    %8 = vector.broadcast %7 : vector<1x128xf32> to vector<64x128xf32>
    %9 = arith.addf %6, %8 : vector<64x128xf32>
    %c0_8 = arith.constant 0 : index
    %c0_9 = arith.constant 0 : index
    %10 = vector.load %arg12[%c0_8, %c0_9] : memref<64x128xf32, #tpu.memory_space<vmem>>, vector<64x128xf32>
    tpu.vector_store %arg12[%c0_8, %c0_9], %9 {strides = array<i32>} : memref<64x128xf32, #tpu.memory_space<vmem>>, vector<64x128xf32>,
    %c0_10 = arith.constant 0 : index
    %c0_11 = arith.constant 0 : index
    %11 = vector.load %arg8[%c0_10, %c0_11] : memref<1x128xf32, #tpu.memory_space<vmem>>, vector<1x128xf32>
    %12 = vector.shape_cast %11 : vector<1x128xf32> to vector<1x128xf32>
    %13 = vector.broadcast %12 : vector<1x128xf32> to vector<8x128xf32>
    %c0_12 = arith.constant 0 : index
    %c0_13 = arith.constant 0 : index
    %14 = vector.load %arg13[%c0_12, %c0_13] : memref<8x32xf32, #tpu.memory_space<vmem>>, vector<8x32xf32>
    %c0_14 = arith.constant 0 : index
    %c0_15 = arith.constant 0 : index
    %15 = vector.load %arg14[%c0_14, %c0_15] : memref<8x32xf32, #tpu.memory_space<vmem>>, vector<8x32xf32>
    %c0_16 = arith.constant 0 : index
    %c0_17 = arith.constant 0 : index
    %16 = vector.load %arg15[%c0_16, %c0_17] : memref<8x32xf32, #tpu.memory_space<vmem>>, vector<8x32xf32>
    %c0_18 = arith.constant 0 : index
    %c0_19 = arith.constant 0 : index
    %17 = vector.load %arg16[%c0_18, %c0_19] : memref<8x32xf32, #tpu.memory_space<vmem>>, vector<8x32xf32>
    %c0_i32_20 = arith.constant 0 : i32
    %c8_i32 = arith.constant 8 : i32
    %18 = arith.muli %c0_i32_20, %c8_i32 : i32
    %19 = tpu.assume_multiple %18, 8 : i32
    %20 = arith.index_cast %19 : i32 to index
    %c0_21 = arith.constant 0 : index
    %21 = vector.load %arg12[%20, %c0_21] : memref<64x128xf32, #tpu.memory_space<vmem>>, vector<8x128xf32>
    %22 = arith.truncf %14 : vector<8x32xf32> to vector<8x32xbf16>
    %c0_22 = arith.constant 0 : index
    %c0_23 = arith.constant 0 : index
    %23 = vector.load %arg5[%c0_22, %c0_23] : memref<32x128xbf16, #tpu.memory_space<vmem>>, vector<32x128xbf16>
    %cst_24 = arith.constant dense<0.000000e+00> : vector<8x128xf32>
    %24 = tpu.matmul %22, %23, %cst_24 {dimension_numbers = #tpu.dot_dimension_numbers<[1], [0], [0], [1], [0, 0, 1, 1], [], []>} : vector<8x32xbf16>, vector<32x128xbf16>, vector<8x128xf32> -> vector<8x128xf32>
    %25 = arith.addf %21, %24 : vector<8x128xf32>
    %26 = vector.extract_strided_slice %25 {offsets = [0, 0], sizes = [8, 32], strides = [1, 1]} : vector<8x128xf32> to vector<8x32xf32>
    %27 = arith.negf %26 : vector<8x32xf32>
    %28 = math.exp %27 : vector<8x32xf32>
    %cst_25 = arith.constant 1.000000e+00 : f32
    %29 = vector.broadcast %cst_25 : f32 to vector<8x32xf32>
    %30 = arith.addf %29, %28 : vector<8x32xf32>
    %31 = arith.divf %29, %30 : vector<8x32xf32>
    %32 = vector.extract_strided_slice %25 {offsets = [0, 32], sizes = [8, 32], strides = [1, 1]} : vector<8x128xf32> to vector<8x32xf32>
    %33 = arith.negf %32 : vector<8x32xf32>
    %34 = math.exp %33 : vector<8x32xf32>
    %cst_26 = arith.constant 1.000000e+00 : f32
    %35 = vector.broadcast %cst_26 : f32 to vector<8x32xf32>
    %36 = arith.addf %35, %34 : vector<8x32xf32>
    %37 = arith.divf %35, %36 : vector<8x32xf32>
    %38 = vector.extract_strided_slice %25 {offsets = [0, 64], sizes = [8, 32], strides = [1, 1]} : vector<8x128xf32> to vector<8x32xf32>
    %39 = math.tanh %38 : vector<8x32xf32>
    %40 = vector.extract_strided_slice %25 {offsets = [0, 96], sizes = [8, 32], strides = [1, 1]} : vector<8x128xf32> to vector<8x32xf32>
    %41 = arith.negf %40 : vector<8x32xf32>
    %42 = math.exp %41 : vector<8x32xf32>
    %cst_27 = arith.constant 1.000000e+00 : f32
    %43 = vector.broadcast %cst_27 : f32 to vector<8x32xf32>
    %44 = arith.addf %43, %42 : vector<8x32xf32>
    %45 = arith.divf %43, %44 : vector<8x32xf32>
    %46 = arith.mulf %37, %15 : vector<8x32xf32>
    %47 = arith.mulf %31, %39 : vector<8x32xf32>
    %48 = arith.addf %46, %47 : vector<8x32xf32>
    %49 = math.tanh %48 : vector<8x32xf32>
    %50 = arith.mulf %45, %49 : vector<8x32xf32>
    %51 = arith.truncf %16 : vector<8x32xf32> to vector<8x32xbf16>
    %c0_28 = arith.constant 0 : index
    %c0_29 = arith.constant 0 : index
    %52 = vector.load %arg7[%c0_28, %c0_29] : memref<32x128xbf16, #tpu.memory_space<vmem>>, vector<32x128xbf16>
    %cst_30 = arith.constant dense<0.000000e+00> : vector<8x128xf32>
    %53 = tpu.matmul %51, %52, %cst_30 {dimension_numbers = #tpu.dot_dimension_numbers<[1], [0], [0], [1], [0, 0, 1, 1], [], []>} : vector<8x32xbf16>, vector<32x128xbf16>, vector<8x128xf32> -> vector<8x128xf32>
    %54 = arith.truncf %50 : vector<8x32xf32> to vector<8x32xbf16>
    %c0_31 = arith.constant 0 : index
    %c0_32 = arith.constant 0 : index
    %55 = vector.load %arg6[%c0_31, %c0_32] : memref<32x128xbf16, #tpu.memory_space<vmem>>, vector<32x128xbf16>
    %cst_33 = arith.constant dense<0.000000e+00> : vector<8x128xf32>
    %56 = tpu.matmul %54, %55, %cst_33 {dimension_numbers = #tpu.dot_dimension_numbers<[1], [0], [0], [1], [0, 0, 1, 1], [], []>} : vector<8x32xbf16>, vector<32x128xbf16>, vector<8x128xf32> -> vector<8x128xf32>
    %57 = arith.addf %53, %56 : vector<8x128xf32>
    %58 = arith.addf %57, %13 : vector<8x128xf32>
    %59 = vector.extract_strided_slice %58 {offsets = [0, 0], sizes = [8, 32], strides = [1, 1]} : vector<8x128xf32> to vector<8x32xf32>
    %60 = arith.negf %59 : vector<8x32xf32>
    %61 = math.exp %60 : vector<8x32xf32>
    %cst_34 = arith.constant 1.000000e+00 : f32
    %62 = vector.broadcast %cst_34 : f32 to vector<8x32xf32>
    %63 = arith.addf %62, %61 : vector<8x32xf32>
    %64 = arith.divf %62, %63 : vector<8x32xf32>
    %65 = vector.extract_strided_slice %58 {offsets = [0, 32], sizes = [8, 32], strides = [1, 1]} : vector<8x128xf32> to vector<8x32xf32>
    %66 = arith.negf %65 : vector<8x32xf32>
    %67 = math.exp %66 : vector<8x32xf32>
    %cst_35 = arith.constant 1.000000e+00 : f32
    %68 = vector.broadcast %cst_35 : f32 to vector<8x32xf32>
    %69 = arith.addf %68, %67 : vector<8x32xf32>
    %70 = arith.divf %68, %69 : vector<8x32xf32>
    %71 = vector.extract_strided_slice %58 {offsets = [0, 64], sizes = [8, 32], strides = [1, 1]} : vector<8x128xf32> to vector<8x32xf32>
    %72 = math.tanh %71 : vector<8x32xf32>
    %73 = vector.extract_strided_slice %58 {offsets = [0, 96], sizes = [8, 32], strides = [1, 1]} : vector<8x128xf32> to vector<8x32xf32>
    %74 = arith.negf %73 : vector<8x32xf32>
    %75 = math.exp %74 : vector<8x32xf32>
    %cst_36 = arith.constant 1.000000e+00 : f32
    %76 = vector.broadcast %cst_36 : f32 to vector<8x32xf32>
    %77 = arith.addf %76, %75 : vector<8x32xf32>
    %78 = arith.divf %76, %77 : vector<8x32xf32>
    %79 = arith.mulf %70, %17 : vector<8x32xf32>
    %80 = arith.mulf %64, %72 : vector<8x32xf32>
    %81 = arith.addf %79, %80 : vector<8x32xf32>
    %82 = math.tanh %81 : vector<8x32xf32>
    %83 = arith.mulf %78, %82 : vector<8x32xf32>
    %c1_i32 = arith.constant 1 : i32
    %c8_i32_37 = arith.constant 8 : i32
    %84 = arith.muli %c1_i32, %c8_i32_37 : i32
    %85 = tpu.assume_multiple %84, 8 : i32
    %86 = arith.index_cast %85 : i32 to index
    %c0_38 = arith.constant 0 : index
    %87 = vector.load %arg12[%86, %c0_38] : memref<64x128xf32, #tpu.memory_space<vmem>>, vector<8x128xf32>
    %88 = arith.truncf %50 : vector<8x32xf32> to vector<8x32xbf16>
    %c0_39 = arith.constant 0 : index
    %c0_40 = arith.constant 0 : index
    %89 = vector.load %arg5[%c0_39, %c0_40] : memref<32x128xbf16, #tpu.memory_space<vmem>>, vector<32x128xbf16>
    %cst_41 = arith.constant dense<0.000000e+00> : vector<8x128xf32>
    %90 = tpu.matmul %88, %89, %cst_41 {dimension_numbers = #tpu.dot_dimension_numbers<[1], [0], [0], [1], [0, 0, 1, 1], [], []>} : vector<8x32xbf16>, vector<32x128xbf16>, vector<8x128xf32> -> vector<8x128xf32>
    %91 = arith.addf %87, %90 : vector<8x128xf32>
    %92 = vector.extract_strided_slice %91 {offsets = [0, 0], sizes = [8, 32], strides = [1, 1]} : vector<8x128xf32> to vector<8x32xf32>
    %93 = arith.negf %92 : vector<8x32xf32>
    %94 = math.exp %93 : vector<8x32xf32>
    %cst_42 = arith.constant 1.000000e+00 : f32
    %95 = vector.broadcast %cst_42 : f32 to vector<8x32xf32>
    %96 = arith.addf %95, %94 : vector<8x32xf32>
    %97 = arith.divf %95, %96 : vector<8x32xf32>
    %98 = vector.extract_strided_slice %91 {offsets = [0, 32], sizes = [8, 32], strides = [1, 1]} : vector<8x128xf32> to vector<8x32xf32>
    %99 = arith.negf %98 : vector<8x32xf32>
    %100 = math.exp %99 : vector<8x32xf32>
    %cst_43 = arith.constant 1.000000e+00 : f32
    %101 = vector.broadcast %cst_43 : f32 to vector<8x32xf32>
    %102 = arith.addf %101, %100 : vector<8x32xf32>
    %103 = arith.divf %101, %102 : vector<8x32xf32>
    %104 = vector.extract_strided_slice %91 {offsets = [0, 64], sizes = [8, 32], strides = [1, 1]} : vector<8x128xf32> to vector<8x32xf32>
    %105 = math.tanh %104 : vector<8x32xf32>
    %106 = vector.extract_strided_slice %91 {offsets = [0, 96], sizes = [8, 32], strides = [1, 1]} : vector<8x128xf32> to vector<8x32xf32>
    %107 = arith.negf %106 : vector<8x32xf32>
    %108 = math.exp %107 : vector<8x32xf32>
    %cst_44 = arith.constant 1.000000e+00 : f32
    %109 = vector.broadcast %cst_44 : f32 to vector<8x32xf32>
    %110 = arith.addf %109, %108 : vector<8x32xf32>
    %111 = arith.divf %109, %110 : vector<8x32xf32>
    %112 = arith.mulf %103, %48 : vector<8x32xf32>
    %113 = arith.mulf %97, %105 : vector<8x32xf32>
    %114 = arith.addf %112, %113 : vector<8x32xf32>
    %115 = math.tanh %114 : vector<8x32xf32>
    %116 = arith.mulf %111, %115 : vector<8x32xf32>
    %117 = arith.truncf %83 : vector<8x32xf32> to vector<8x32xbf16>
    %c0_45 = arith.constant 0 : index
    %c0_46 = arith.constant 0 : index
    %118 = vector.load %arg7[%c0_45, %c0_46] : memref<32x128xbf16, #tpu.memory_space<vmem>>, vector<32x128xbf16>
    %cst_47 = arith.constant dense<0.000000e+00> : vector<8x128xf32>
    %119 = tpu.matmul %117, %118, %cst_47 {dimension_numbers = #tpu.dot_dimension_numbers<[1], [0], [0], [1], [0, 0, 1, 1], [], []>} : vector<8x32xbf16>, vector<32x128xbf16>, vector<8x128xf32> -> vector<8x128xf32>
    %120 = arith.truncf %116 : vector<8x32xf32> to vector<8x32xbf16>
    %c0_48 = arith.constant 0 : index
    %c0_49 = arith.constant 0 : index
    %121 = vector.load %arg6[%c0_48, %c0_49] : memref<32x128xbf16, #tpu.memory_space<vmem>>, vector<32x128xbf16>
    %cst_50 = arith.constant dense<0.000000e+00> : vector<8x128xf32>
    %122 = tpu.matmul %120, %121, %cst_50 {dimension_numbers = #tpu.dot_dimension_numbers<[1], [0], [0], [1], [0, 0, 1, 1], [], []>} : vector<8x32xbf16>, vector<32x128xbf16>, vector<8x128xf32> -> vector<8x128xf32>
    %123 = arith.addf %119, %122 : vector<8x128xf32>
    %124 = arith.addf %123, %13 : vector<8x128xf32>
    %125 = vector.extract_strided_slice %124 {offsets = [0, 0], sizes = [8, 32], strides = [1, 1]} : vector<8x128xf32> to vector<8x32xf32>
    %126 = arith.negf %125 : vector<8x32xf32>
    %127 = math.exp %126 : vector<8x32xf32>
    %cst_51 = arith.constant 1.000000e+00 : f32
    %128 = vector.broadcast %cst_51 : f32 to vector<8x32xf32>
    %129 = arith.addf %128, %127 : vector<8x32xf32>
    %130 = arith.divf %128, %129 : vector<8x32xf32>
    %131 = vector.extract_strided_slice %124 {offsets = [0, 32], sizes = [8, 32], strides = [1, 1]} : vector<8x128xf32> to vector<8x32xf32>
    %132 = arith.negf %131 : vector<8x32xf32>
    %133 = math.exp %132 : vector<8x32xf32>
    %cst_52 = arith.constant 1.000000e+00 : f32
    %134 = vector.broadcast %cst_52 : f32 to vector<8x32xf32>
    %135 = arith.addf %134, %133 : vector<8x32xf32>
    %136 = arith.divf %134, %135 : vector<8x32xf32>
    %137 = vector.extract_strided_slice %124 {offsets = [0, 64], sizes = [8, 32], strides = [1, 1]} : vector<8x128xf32> to vector<8x32xf32>
    %138 = math.tanh %137 : vector<8x32xf32>
    %139 = vector.extract_strided_slice %124 {offsets = [0, 96], sizes = [8, 32], strides = [1, 1]} : vector<8x128xf32> to vector<8x32xf32>
    %140 = arith.negf %139 : vector<8x32xf32>
    %141 = math.exp %140 : vector<8x32xf32>
    %cst_53 = arith.constant 1.000000e+00 : f32
    %142 = vector.broadcast %cst_53 : f32 to vector<8x32xf32>
    %143 = arith.addf %142, %141 : vector<8x32xf32>
    %144 = arith.divf %142, %143 : vector<8x32xf32>
    %145 = arith.mulf %136, %81 : vector<8x32xf32>
    %146 = arith.mulf %130, %138 : vector<8x32xf32>
    %147 = arith.addf %145, %146 : vector<8x32xf32>
    %148 = math.tanh %147 : vector<8x32xf32>
    %149 = arith.mulf %144, %148 : vector<8x32xf32>
    %c2_i32 = arith.constant 2 : i32
    %c8_i32_54 = arith.constant 8 : i32
    %150 = arith.muli %c2_i32, %c8_i32_54 : i32
    %151 = tpu.assume_multiple %150, 8 : i32
    %152 = arith.index_cast %151 : i32 to index
    %c0_55 = arith.constant 0 : index
    %153 = vector.load %arg12[%152, %c0_55] : memref<64x128xf32, #tpu.memory_space<vmem>>, vector<8x128xf32>
    %154 = arith.truncf %116 : vector<8x32xf32> to vector<8x32xbf16>
    %c0_56 = arith.constant 0 : index
    %c0_57 = arith.constant 0 : index
    %155 = vector.load %arg5[%c0_56, %c0_57] : memref<32x128xbf16, #tpu.memory_space<vmem>>, vector<32x128xbf16>
    %cst_58 = arith.constant dense<0.000000e+00> : vector<8x128xf32>
    %156 = tpu.matmul %154, %155, %cst_58 {dimension_numbers = #tpu.dot_dimension_numbers<[1], [0], [0], [1], [0, 0, 1, 1], [], []>} : vector<8x32xbf16>, vector<32x128xbf16>, vector<8x128xf32> -> vector<8x128xf32>
    %157 = arith.addf %153, %156 : vector<8x128xf32>
    %158 = vector.extract_strided_slice %157 {offsets = [0, 0], sizes = [8, 32], strides = [1, 1]} : vector<8x128xf32> to vector<8x32xf32>
    %159 = arith.negf %158 : vector<8x32xf32>
    %160 = math.exp %159 : vector<8x32xf32>
    %cst_59 = arith.constant 1.000000e+00 : f32
    %161 = vector.broadcast %cst_59 : f32 to vector<8x32xf32>
    %162 = arith.addf %161, %160 : vector<8x32xf32>
    %163 = arith.divf %161, %162 : vector<8x32xf32>
    %164 = vector.extract_strided_slice %157 {offsets = [0, 32], sizes = [8, 32], strides = [1, 1]} : vector<8x128xf32> to vector<8x32xf32>
    %165 = arith.negf %164 : vector<8x32xf32>
    %166 = math.exp %165 : vector<8x32xf32>
    %cst_60 = arith.constant 1.000000e+00 : f32
    %167 = vector.broadcast %cst_60 : f32 to vector<8x32xf32>
    %168 = arith.addf %167, %166 : vector<8x32xf32>
    %169 = arith.divf %167, %168 : vector<8x32xf32>
    %170 = vector.extract_strided_slice %157 {offsets = [0, 64], sizes = [8, 32], strides = [1, 1]} : vector<8x128xf32> to vector<8x32xf32>
    %171 = math.tanh %170 : vector<8x32xf32>
    %172 = vector.extract_strided_slice %157 {offsets = [0, 96], sizes = [8, 32], strides = [1, 1]} : vector<8x128xf32> to vector<8x32xf32>
    %173 = arith.negf %172 : vector<8x32xf32>
    %174 = math.exp %173 : vector<8x32xf32>
    %cst_61 = arith.constant 1.000000e+00 : f32
    %175 = vector.broadcast %cst_61 : f32 to vector<8x32xf32>
    %176 = arith.addf %175, %174 : vector<8x32xf32>
    %177 = arith.divf %175, %176 : vector<8x32xf32>
    %178 = arith.mulf %169, %114 : vector<8x32xf32>
    %179 = arith.mulf %163, %171 : vector<8x32xf32>
    %180 = arith.addf %178, %179 : vector<8x32xf32>
    %181 = math.tanh %180 : vector<8x32xf32>
    %182 = arith.mulf %177, %181 : vector<8x32xf32>
    %183 = arith.truncf %149 : vector<8x32xf32> to vector<8x32xbf16>
    %c0_62 = arith.constant 0 : index
    %c0_63 = arith.constant 0 : index
    %184 = vector.load %arg7[%c0_62, %c0_63] : memref<32x128xbf16, #tpu.memory_space<vmem>>, vector<32x128xbf16>
    %cst_64 = arith.constant dense<0.000000e+00> : vector<8x128xf32>
    %185 = tpu.matmul %183, %184, %cst_64 {dimension_numbers = #tpu.dot_dimension_numbers<[1], [0], [0], [1], [0, 0, 1, 1], [], []>} : vector<8x32xbf16>, vector<32x128xbf16>, vector<8x128xf32> -> vector<8x128xf32>
    %186 = arith.truncf %182 : vector<8x32xf32> to vector<8x32xbf16>
    %c0_65 = arith.constant 0 : index
    %c0_66 = arith.constant 0 : index
    %187 = vector.load %arg6[%c0_65, %c0_66] : memref<32x128xbf16, #tpu.memory_space<vmem>>, vector<32x128xbf16>
    %cst_67 = arith.constant dense<0.000000e+00> : vector<8x128xf32>
    %188 = tpu.matmul %186, %187, %cst_67 {dimension_numbers = #tpu.dot_dimension_numbers<[1], [0], [0], [1], [0, 0, 1, 1], [], []>} : vector<8x32xbf16>, vector<32x128xbf16>, vector<8x128xf32> -> vector<8x128xf32>
    %189 = arith.addf %185, %188 : vector<8x128xf32>
    %190 = arith.addf %189, %13 : vector<8x128xf32>
    %191 = vector.extract_strided_slice %190 {offsets = [0, 0], sizes = [8, 32], strides = [1, 1]} : vector<8x128xf32> to vector<8x32xf32>
    %192 = arith.negf %191 : vector<8x32xf32>
    %193 = math.exp %192 : vector<8x32xf32>
    %cst_68 = arith.constant 1.000000e+00 : f32
    %194 = vector.broadcast %cst_68 : f32 to vector<8x32xf32>
    %195 = arith.addf %194, %193 : vector<8x32xf32>
    %196 = arith.divf %194, %195 : vector<8x32xf32>
    %197 = vector.extract_strided_slice %190 {offsets = [0, 32], sizes = [8, 32], strides = [1, 1]} : vector<8x128xf32> to vector<8x32xf32>
    %198 = arith.negf %197 : vector<8x32xf32>
    %199 = math.exp %198 : vector<8x32xf32>
    %cst_69 = arith.constant 1.000000e+00 : f32
    %200 = vector.broadcast %cst_69 : f32 to vector<8x32xf32>
    %201 = arith.addf %200, %199 : vector<8x32xf32>
    %202 = arith.divf %200, %201 : vector<8x32xf32>
    %203 = vector.extract_strided_slice %190 {offsets = [0, 64], sizes = [8, 32], strides = [1, 1]} : vector<8x128xf32> to vector<8x32xf32>
    %204 = math.tanh %203 : vector<8x32xf32>
    %205 = vector.extract_strided_slice %190 {offsets = [0, 96], sizes = [8, 32], strides = [1, 1]} : vector<8x128xf32> to vector<8x32xf32>
    %206 = arith.negf %205 : vector<8x32xf32>
    %207 = math.exp %206 : vector<8x32xf32>
    %cst_70 = arith.constant 1.000000e+00 : f32
    %208 = vector.broadcast %cst_70 : f32 to vector<8x32xf32>
    %209 = arith.addf %208, %207 : vector<8x32xf32>
    %210 = arith.divf %208, %209 : vector<8x32xf32>
    %211 = arith.mulf %202, %147 : vector<8x32xf32>
    %212 = arith.mulf %196, %204 : vector<8x32xf32>
    %213 = arith.addf %211, %212 : vector<8x32xf32>
    %214 = math.tanh %213 : vector<8x32xf32>
    %215 = arith.mulf %210, %214 : vector<8x32xf32>
    %c3_i32 = arith.constant 3 : i32
    %c8_i32_71 = arith.constant 8 : i32
    %216 = arith.muli %c3_i32, %c8_i32_71 : i32
    %217 = tpu.assume_multiple %216, 8 : i32
    %218 = arith.index_cast %217 : i32 to index
    %c0_72 = arith.constant 0 : index
    %219 = vector.load %arg12[%218, %c0_72] : memref<64x128xf32, #tpu.memory_space<vmem>>, vector<8x128xf32>
    %220 = arith.truncf %182 : vector<8x32xf32> to vector<8x32xbf16>
    %c0_73 = arith.constant 0 : index
    %c0_74 = arith.constant 0 : index
    %221 = vector.load %arg5[%c0_73, %c0_74] : memref<32x128xbf16, #tpu.memory_space<vmem>>, vector<32x128xbf16>
    %cst_75 = arith.constant dense<0.000000e+00> : vector<8x128xf32>
    %222 = tpu.matmul %220, %221, %cst_75 {dimension_numbers = #tpu.dot_dimension_numbers<[1], [0], [0], [1], [0, 0, 1, 1], [], []>} : vector<8x32xbf16>, vector<32x128xbf16>, vector<8x128xf32> -> vector<8x128xf32>
    %223 = arith.addf %219, %222 : vector<8x128xf32>
    %224 = vector.extract_strided_slice %223 {offsets = [0, 0], sizes = [8, 32], strides = [1, 1]} : vector<8x128xf32> to vector<8x32xf32>
    %225 = arith.negf %224 : vector<8x32xf32>
    %226 = math.exp %225 : vector<8x32xf32>
    %cst_76 = arith.constant 1.000000e+00 : f32
    %227 = vector.broadcast %cst_76 : f32 to vector<8x32xf32>
    %228 = arith.addf %227, %226 : vector<8x32xf32>
    %229 = arith.divf %227, %228 : vector<8x32xf32>
    %230 = vector.extract_strided_slice %223 {offsets = [0, 32], sizes = [8, 32], strides = [1, 1]} : vector<8x128xf32> to vector<8x32xf32>
    %231 = arith.negf %230 : vector<8x32xf32>
    %232 = math.exp %231 : vector<8x32xf32>
    %cst_77 = arith.constant 1.000000e+00 : f32
    %233 = vector.broadcast %cst_77 : f32 to vector<8x32xf32>
    %234 = arith.addf %233, %232 : vector<8x32xf32>
    %235 = arith.divf %233, %234 : vector<8x32xf32>
    %236 = vector.extract_strided_slice %223 {offsets = [0, 64], sizes = [8, 32], strides = [1, 1]} : vector<8x128xf32> to vector<8x32xf32>
    %237 = math.tanh %236 : vector<8x32xf32>
    %238 = vector.extract_strided_slice %223 {offsets = [0, 96], sizes = [8, 32], strides = [1, 1]} : vector<8x128xf32> to vector<8x32xf32>
    %239 = arith.negf %238 : vector<8x32xf32>
    %240 = math.exp %239 : vector<8x32xf32>
    %cst_78 = arith.constant 1.000000e+00 : f32
    %241 = vector.broadcast %cst_78 : f32 to vector<8x32xf32>
    %242 = arith.addf %241, %240 : vector<8x32xf32>
    %243 = arith.divf %241, %242 : vector<8x32xf32>
    %244 = arith.mulf %235, %180 : vector<8x32xf32>
    %245 = arith.mulf %229, %237 : vector<8x32xf32>
    %246 = arith.addf %244, %245 : vector<8x32xf32>
    %247 = math.tanh %246 : vector<8x32xf32>
    %248 = arith.mulf %243, %247 : vector<8x32xf32>
    %249 = arith.truncf %215 : vector<8x32xf32> to vector<8x32xbf16>
    %c0_79 = arith.constant 0 : index
    %c0_80 = arith.constant 0 : index
    %250 = vector.load %arg7[%c0_79, %c0_80] : memref<32x128xbf16, #tpu.memory_space<vmem>>, vector<32x128xbf16>
    %cst_81 = arith.constant dense<0.000000e+00> : vector<8x128xf32>
    %251 = tpu.matmul %249, %250, %cst_81 {dimension_numbers = #tpu.dot_dimension_numbers<[1], [0], [0], [1], [0, 0, 1, 1], [], []>} : vector<8x32xbf16>, vector<32x128xbf16>, vector<8x128xf32> -> vector<8x128xf32>
    %252 = arith.truncf %248 : vector<8x32xf32> to vector<8x32xbf16>
    %c0_82 = arith.constant 0 : index
    %c0_83 = arith.constant 0 : index
    %253 = vector.load %arg6[%c0_82, %c0_83] : memref<32x128xbf16, #tpu.memory_space<vmem>>, vector<32x128xbf16>
    %cst_84 = arith.constant dense<0.000000e+00> : vector<8x128xf32>
    %254 = tpu.matmul %252, %253, %cst_84 {dimension_numbers = #tpu.dot_dimension_numbers<[1], [0], [0], [1], [0, 0, 1, 1], [], []>} : vector<8x32xbf16>, vector<32x128xbf16>, vector<8x128xf32> -> vector<8x128xf32>
    %255 = arith.addf %251, %254 : vector<8x128xf32>
    %256 = arith.addf %255, %13 : vector<8x128xf32>
    %257 = vector.extract_strided_slice %256 {offsets = [0, 0], sizes = [8, 32], strides = [1, 1]} : vector<8x128xf32> to vector<8x32xf32>
    %258 = arith.negf %257 : vector<8x32xf32>
    %259 = math.exp %258 : vector<8x32xf32>
    %cst_85 = arith.constant 1.000000e+00 : f32
    %260 = vector.broadcast %cst_85 : f32 to vector<8x32xf32>
    %261 = arith.addf %260, %259 : vector<8x32xf32>
    %262 = arith.divf %260, %261 : vector<8x32xf32>
    %263 = vector.extract_strided_slice %256 {offsets = [0, 32], sizes = [8, 32], strides = [1, 1]} : vector<8x128xf32> to vector<8x32xf32>
    %264 = arith.negf %263 : vector<8x32xf32>
    %265 = math.exp %264 : vector<8x32xf32>
    %cst_86 = arith.constant 1.000000e+00 : f32
    %266 = vector.broadcast %cst_86 : f32 to vector<8x32xf32>
    %267 = arith.addf %266, %265 : vector<8x32xf32>
    %268 = arith.divf %266, %267 : vector<8x32xf32>
    %269 = vector.extract_strided_slice %256 {offsets = [0, 64], sizes = [8, 32], strides = [1, 1]} : vector<8x128xf32> to vector<8x32xf32>
    %270 = math.tanh %269 : vector<8x32xf32>
    %271 = vector.extract_strided_slice %256 {offsets = [0, 96], sizes = [8, 32], strides = [1, 1]} : vector<8x128xf32> to vector<8x32xf32>
    %272 = arith.negf %271 : vector<8x32xf32>
    %273 = math.exp %272 : vector<8x32xf32>
    %cst_87 = arith.constant 1.000000e+00 : f32
    %274 = vector.broadcast %cst_87 : f32 to vector<8x32xf32>
    %275 = arith.addf %274, %273 : vector<8x32xf32>
    %276 = arith.divf %274, %275 : vector<8x32xf32>
    %277 = arith.mulf %268, %213 : vector<8x32xf32>
    %278 = arith.mulf %262, %270 : vector<8x32xf32>
    %279 = arith.addf %277, %278 : vector<8x32xf32>
    %280 = math.tanh %279 : vector<8x32xf32>
    %281 = arith.mulf %276, %280 : vector<8x32xf32>
    %c4_i32 = arith.constant 4 : i32
    %c8_i32_88 = arith.constant 8 : i32
    %282 = arith.muli %c4_i32, %c8_i32_88 : i32
    %283 = tpu.assume_multiple %282, 8 : i32
    %284 = arith.index_cast %283 : i32 to index
    %c0_89 = arith.constant 0 : index
    %285 = vector.load %arg12[%284, %c0_89] : memref<64x128xf32, #tpu.memory_space<vmem>>, vector<8x128xf32>
    %286 = arith.truncf %248 : vector<8x32xf32> to vector<8x32xbf16>
    %c0_90 = arith.constant 0 : index
    %c0_91 = arith.constant 0 : index
    %287 = vector.load %arg5[%c0_90, %c0_91] : memref<32x128xbf16, #tpu.memory_space<vmem>>, vector<32x128xbf16>
    %cst_92 = arith.constant dense<0.000000e+00> : vector<8x128xf32>
    %288 = tpu.matmul %286, %287, %cst_92 {dimension_numbers = #tpu.dot_dimension_numbers<[1], [0], [0], [1], [0, 0, 1, 1], [], []>} : vector<8x32xbf16>, vector<32x128xbf16>, vector<8x128xf32> -> vector<8x128xf32>
    %289 = arith.addf %285, %288 : vector<8x128xf32>
    %290 = vector.extract_strided_slice %289 {offsets = [0, 0], sizes = [8, 32], strides = [1, 1]} : vector<8x128xf32> to vector<8x32xf32>
    %291 = arith.negf %290 : vector<8x32xf32>
    %292 = math.exp %291 : vector<8x32xf32>
    %cst_93 = arith.constant 1.000000e+00 : f32
    %293 = vector.broadcast %cst_93 : f32 to vector<8x32xf32>
    %294 = arith.addf %293, %292 : vector<8x32xf32>
    %295 = arith.divf %293, %294 : vector<8x32xf32>
    %296 = vector.extract_strided_slice %289 {offsets = [0, 32], sizes = [8, 32], strides = [1, 1]} : vector<8x128xf32> to vector<8x32xf32>
    %297 = arith.negf %296 : vector<8x32xf32>
    %298 = math.exp %297 : vector<8x32xf32>
    %cst_94 = arith.constant 1.000000e+00 : f32
    %299 = vector.broadcast %cst_94 : f32 to vector<8x32xf32>
    %300 = arith.addf %299, %298 : vector<8x32xf32>
    %301 = arith.divf %299, %300 : vector<8x32xf32>
    %302 = vector.extract_strided_slice %289 {offsets = [0, 64], sizes = [8, 32], strides = [1, 1]} : vector<8x128xf32> to vector<8x32xf32>
    %303 = math.tanh %302 : vector<8x32xf32>
    %304 = vector.extract_strided_slice %289 {offsets = [0, 96], sizes = [8, 32], strides = [1, 1]} : vector<8x128xf32> to vector<8x32xf32>
    %305 = arith.negf %304 : vector<8x32xf32>
    %306 = math.exp %305 : vector<8x32xf32>
    %cst_95 = arith.constant 1.000000e+00 : f32
    %307 = vector.broadcast %cst_95 : f32 to vector<8x32xf32>
    %308 = arith.addf %307, %306 : vector<8x32xf32>
    %309 = arith.divf %307, %308 : vector<8x32xf32>
    %310 = arith.mulf %301, %246 : vector<8x32xf32>
    %311 = arith.mulf %295, %303 : vector<8x32xf32>
    %312 = arith.addf %310, %311 : vector<8x32xf32>
    %313 = math.tanh %312 : vector<8x32xf32>
    %314 = arith.mulf %309, %313 : vector<8x32xf32>
    %315 = arith.truncf %281 : vector<8x32xf32> to vector<8x32xbf16>
    %c0_96 = arith.constant 0 : index
    %c0_97 = arith.constant 0 : index
    %316 = vector.load %arg7[%c0_96, %c0_97] : memref<32x128xbf16, #tpu.memory_space<vmem>>, vector<32x128xbf16>
    %cst_98 = arith.constant dense<0.000000e+00> : vector<8x128xf32>
    %317 = tpu.matmul %315, %316, %cst_98 {dimension_numbers = #tpu.dot_dimension_numbers<[1], [0], [0], [1], [0, 0, 1, 1], [], []>} : vector<8x32xbf16>, vector<32x128xbf16>, vector<8x128xf32> -> vector<8x128xf32>
    %318 = arith.truncf %314 : vector<8x32xf32> to vector<8x32xbf16>
    %c0_99 = arith.constant 0 : index
    %c0_100 = arith.constant 0 : index
    %319 = vector.load %arg6[%c0_99, %c0_100] : memref<32x128xbf16, #tpu.memory_space<vmem>>, vector<32x128xbf16>
    %cst_101 = arith.constant dense<0.000000e+00> : vector<8x128xf32>
    %320 = tpu.matmul %318, %319, %cst_101 {dimension_numbers = #tpu.dot_dimension_numbers<[1], [0], [0], [1], [0, 0, 1, 1], [], []>} : vector<8x32xbf16>, vector<32x128xbf16>, vector<8x128xf32> -> vector<8x128xf32>
    %321 = arith.addf %317, %320 : vector<8x128xf32>
    %322 = arith.addf %321, %13 : vector<8x128xf32>
    %323 = vector.extract_strided_slice %322 {offsets = [0, 0], sizes = [8, 32], strides = [1, 1]} : vector<8x128xf32> to vector<8x32xf32>
    %324 = arith.negf %323 : vector<8x32xf32>
    %325 = math.exp %324 : vector<8x32xf32>
    %cst_102 = arith.constant 1.000000e+00 : f32
    %326 = vector.broadcast %cst_102 : f32 to vector<8x32xf32>
    %327 = arith.addf %326, %325 : vector<8x32xf32>
    %328 = arith.divf %326, %327 : vector<8x32xf32>
    %329 = vector.extract_strided_slice %322 {offsets = [0, 32], sizes = [8, 32], strides = [1, 1]} : vector<8x128xf32> to vector<8x32xf32>
    %330 = arith.negf %329 : vector<8x32xf32>
    %331 = math.exp %330 : vector<8x32xf32>
    %cst_103 = arith.constant 1.000000e+00 : f32
    %332 = vector.broadcast %cst_103 : f32 to vector<8x32xf32>
    %333 = arith.addf %332, %331 : vector<8x32xf32>
    %334 = arith.divf %332, %333 : vector<8x32xf32>
    %335 = vector.extract_strided_slice %322 {offsets = [0, 64], sizes = [8, 32], strides = [1, 1]} : vector<8x128xf32> to vector<8x32xf32>
    %336 = math.tanh %335 : vector<8x32xf32>
    %337 = vector.extract_strided_slice %322 {offsets = [0, 96], sizes = [8, 32], strides = [1, 1]} : vector<8x128xf32> to vector<8x32xf32>
    %338 = arith.negf %337 : vector<8x32xf32>
    %339 = math.exp %338 : vector<8x32xf32>
    %cst_104 = arith.constant 1.000000e+00 : f32
    %340 = vector.broadcast %cst_104 : f32 to vector<8x32xf32>
    %341 = arith.addf %340, %339 : vector<8x32xf32>
    %342 = arith.divf %340, %341 : vector<8x32xf32>
    %343 = arith.mulf %334, %279 : vector<8x32xf32>
    %344 = arith.mulf %328, %336 : vector<8x32xf32>
    %345 = arith.addf %343, %344 : vector<8x32xf32>
    %346 = math.tanh %345 : vector<8x32xf32>
    %347 = arith.mulf %342, %346 : vector<8x32xf32>
    %c5_i32 = arith.constant 5 : i32
    %c8_i32_105 = arith.constant 8 : i32
    %348 = arith.muli %c5_i32, %c8_i32_105 : i32
    %349 = tpu.assume_multiple %348, 8 : i32
    %350 = arith.index_cast %349 : i32 to index
    %c0_106 = arith.constant 0 : index
    %351 = vector.load %arg12[%350, %c0_106] : memref<64x128xf32, #tpu.memory_space<vmem>>, vector<8x128xf32>
    %352 = arith.truncf %314 : vector<8x32xf32> to vector<8x32xbf16>
    %c0_107 = arith.constant 0 : index
    %c0_108 = arith.constant 0 : index
    %353 = vector.load %arg5[%c0_107, %c0_108] : memref<32x128xbf16, #tpu.memory_space<vmem>>, vector<32x128xbf16>
    %cst_109 = arith.constant dense<0.000000e+00> : vector<8x128xf32>
    %354 = tpu.matmul %352, %353, %cst_109 {dimension_numbers = #tpu.dot_dimension_numbers<[1], [0], [0], [1], [0, 0, 1, 1], [], []>} : vector<8x32xbf16>, vector<32x128xbf16>, vector<8x128xf32> -> vector<8x128xf32>
    %355 = arith.addf %351, %354 : vector<8x128xf32>
    %356 = vector.extract_strided_slice %355 {offsets = [0, 0], sizes = [8, 32], strides = [1, 1]} : vector<8x128xf32> to vector<8x32xf32>
    %357 = arith.negf %356 : vector<8x32xf32>
    %358 = math.exp %357 : vector<8x32xf32>
    %cst_110 = arith.constant 1.000000e+00 : f32
    %359 = vector.broadcast %cst_110 : f32 to vector<8x32xf32>
    %360 = arith.addf %359, %358 : vector<8x32xf32>
    %361 = arith.divf %359, %360 : vector<8x32xf32>
    %362 = vector.extract_strided_slice %355 {offsets = [0, 32], sizes = [8, 32], strides = [1, 1]} : vector<8x128xf32> to vector<8x32xf32>
    %363 = arith.negf %362 : vector<8x32xf32>
    %364 = math.exp %363 : vector<8x32xf32>
    %cst_111 = arith.constant 1.000000e+00 : f32
    %365 = vector.broadcast %cst_111 : f32 to vector<8x32xf32>
    %366 = arith.addf %365, %364 : vector<8x32xf32>
    %367 = arith.divf %365, %366 : vector<8x32xf32>
    %368 = vector.extract_strided_slice %355 {offsets = [0, 64], sizes = [8, 32], strides = [1, 1]} : vector<8x128xf32> to vector<8x32xf32>
    %369 = math.tanh %368 : vector<8x32xf32>
    %370 = vector.extract_strided_slice %355 {offsets = [0, 96], sizes = [8, 32], strides = [1, 1]} : vector<8x128xf32> to vector<8x32xf32>
    %371 = arith.negf %370 : vector<8x32xf32>
    %372 = math.exp %371 : vector<8x32xf32>
    %cst_112 = arith.constant 1.000000e+00 : f32
    %373 = vector.broadcast %cst_112 : f32 to vector<8x32xf32>
    %374 = arith.addf %373, %372 : vector<8x32xf32>
    %375 = arith.divf %373, %374 : vector<8x32xf32>
    %376 = arith.mulf %367, %312 : vector<8x32xf32>
    %377 = arith.mulf %361, %369 : vector<8x32xf32>
    %378 = arith.addf %376, %377 : vector<8x32xf32>
    %379 = math.tanh %378 : vector<8x32xf32>
    %380 = arith.mulf %375, %379 : vector<8x32xf32>
    %381 = arith.truncf %347 : vector<8x32xf32> to vector<8x32xbf16>
    %c0_113 = arith.constant 0 : index
    %c0_114 = arith.constant 0 : index
    %382 = vector.load %arg7[%c0_113, %c0_114] : memref<32x128xbf16, #tpu.memory_space<vmem>>, vector<32x128xbf16>
    %cst_115 = arith.constant dense<0.000000e+00> : vector<8x128xf32>
    %383 = tpu.matmul %381, %382, %cst_115 {dimension_numbers = #tpu.dot_dimension_numbers<[1], [0], [0], [1], [0, 0, 1, 1], [], []>} : vector<8x32xbf16>, vector<32x128xbf16>, vector<8x128xf32> -> vector<8x128xf32>
    %384 = arith.truncf %380 : vector<8x32xf32> to vector<8x32xbf16>
    %c0_116 = arith.constant 0 : index
    %c0_117 = arith.constant 0 : index
    %385 = vector.load %arg6[%c0_116, %c0_117] : memref<32x128xbf16, #tpu.memory_space<vmem>>, vector<32x128xbf16>
    %cst_118 = arith.constant dense<0.000000e+00> : vector<8x128xf32>
    %386 = tpu.matmul %384, %385, %cst_118 {dimension_numbers = #tpu.dot_dimension_numbers<[1], [0], [0], [1], [0, 0, 1, 1], [], []>} : vector<8x32xbf16>, vector<32x128xbf16>, vector<8x128xf32> -> vector<8x128xf32>
    %387 = arith.addf %383, %386 : vector<8x128xf32>
    %388 = arith.addf %387, %13 : vector<8x128xf32>
    %389 = vector.extract_strided_slice %388 {offsets = [0, 0], sizes = [8, 32], strides = [1, 1]} : vector<8x128xf32> to vector<8x32xf32>
    %390 = arith.negf %389 : vector<8x32xf32>
    %391 = math.exp %390 : vector<8x32xf32>
    %cst_119 = arith.constant 1.000000e+00 : f32
    %392 = vector.broadcast %cst_119 : f32 to vector<8x32xf32>
    %393 = arith.addf %392, %391 : vector<8x32xf32>
    %394 = arith.divf %392, %393 : vector<8x32xf32>
    %395 = vector.extract_strided_slice %388 {offsets = [0, 32], sizes = [8, 32], strides = [1, 1]} : vector<8x128xf32> to vector<8x32xf32>
    %396 = arith.negf %395 : vector<8x32xf32>
    %397 = math.exp %396 : vector<8x32xf32>
    %cst_120 = arith.constant 1.000000e+00 : f32
    %398 = vector.broadcast %cst_120 : f32 to vector<8x32xf32>
    %399 = arith.addf %398, %397 : vector<8x32xf32>
    %400 = arith.divf %398, %399 : vector<8x32xf32>
    %401 = vector.extract_strided_slice %388 {offsets = [0, 64], sizes = [8, 32], strides = [1, 1]} : vector<8x128xf32> to vector<8x32xf32>
    %402 = math.tanh %401 : vector<8x32xf32>
    %403 = vector.extract_strided_slice %388 {offsets = [0, 96], sizes = [8, 32], strides = [1, 1]} : vector<8x128xf32> to vector<8x32xf32>
    %404 = arith.negf %403 : vector<8x32xf32>
    %405 = math.exp %404 : vector<8x32xf32>
    %cst_121 = arith.constant 1.000000e+00 : f32
    %406 = vector.broadcast %cst_121 : f32 to vector<8x32xf32>
    %407 = arith.addf %406, %405 : vector<8x32xf32>
    %408 = arith.divf %406, %407 : vector<8x32xf32>
    %409 = arith.mulf %400, %345 : vector<8x32xf32>
    %410 = arith.mulf %394, %402 : vector<8x32xf32>
    %411 = arith.addf %409, %410 : vector<8x32xf32>
    %412 = math.tanh %411 : vector<8x32xf32>
    %413 = arith.mulf %408, %412 : vector<8x32xf32>
    %c6_i32 = arith.constant 6 : i32
    %c8_i32_122 = arith.constant 8 : i32
    %414 = arith.muli %c6_i32, %c8_i32_122 : i32
    %415 = tpu.assume_multiple %414, 8 : i32
    %416 = arith.index_cast %415 : i32 to index
    %c0_123 = arith.constant 0 : index
    %417 = vector.load %arg12[%416, %c0_123] : memref<64x128xf32, #tpu.memory_space<vmem>>, vector<8x128xf32>
    %418 = arith.truncf %380 : vector<8x32xf32> to vector<8x32xbf16>
    %c0_124 = arith.constant 0 : index
    %c0_125 = arith.constant 0 : index
    %419 = vector.load %arg5[%c0_124, %c0_125] : memref<32x128xbf16, #tpu.memory_space<vmem>>, vector<32x128xbf16>
    %cst_126 = arith.constant dense<0.000000e+00> : vector<8x128xf32>
    %420 = tpu.matmul %418, %419, %cst_126 {dimension_numbers = #tpu.dot_dimension_numbers<[1], [0], [0], [1], [0, 0, 1, 1], [], []>} : vector<8x32xbf16>, vector<32x128xbf16>, vector<8x128xf32> -> vector<8x128xf32>
    %421 = arith.addf %417, %420 : vector<8x128xf32>
    %422 = vector.extract_strided_slice %421 {offsets = [0, 0], sizes = [8, 32], strides = [1, 1]} : vector<8x128xf32> to vector<8x32xf32>
    %423 = arith.negf %422 : vector<8x32xf32>
    %424 = math.exp %423 : vector<8x32xf32>
    %cst_127 = arith.constant 1.000000e+00 : f32
    %425 = vector.broadcast %cst_127 : f32 to vector<8x32xf32>
    %426 = arith.addf %425, %424 : vector<8x32xf32>
    %427 = arith.divf %425, %426 : vector<8x32xf32>
    %428 = vector.extract_strided_slice %421 {offsets = [0, 32], sizes = [8, 32], strides = [1, 1]} : vector<8x128xf32> to vector<8x32xf32>
    %429 = arith.negf %428 : vector<8x32xf32>
    %430 = math.exp %429 : vector<8x32xf32>
    %cst_128 = arith.constant 1.000000e+00 : f32
    %431 = vector.broadcast %cst_128 : f32 to vector<8x32xf32>
    %432 = arith.addf %431, %430 : vector<8x32xf32>
    %433 = arith.divf %431, %432 : vector<8x32xf32>
    %434 = vector.extract_strided_slice %421 {offsets = [0, 64], sizes = [8, 32], strides = [1, 1]} : vector<8x128xf32> to vector<8x32xf32>
    %435 = math.tanh %434 : vector<8x32xf32>
    %436 = vector.extract_strided_slice %421 {offsets = [0, 96], sizes = [8, 32], strides = [1, 1]} : vector<8x128xf32> to vector<8x32xf32>
    %437 = arith.negf %436 : vector<8x32xf32>
    %438 = math.exp %437 : vector<8x32xf32>
    %cst_129 = arith.constant 1.000000e+00 : f32
    %439 = vector.broadcast %cst_129 : f32 to vector<8x32xf32>
    %440 = arith.addf %439, %438 : vector<8x32xf32>
    %441 = arith.divf %439, %440 : vector<8x32xf32>
    %442 = arith.mulf %433, %378 : vector<8x32xf32>
    %443 = arith.mulf %427, %435 : vector<8x32xf32>
    %444 = arith.addf %442, %443 : vector<8x32xf32>
    %445 = math.tanh %444 : vector<8x32xf32>
    %446 = arith.mulf %441, %445 : vector<8x32xf32>
    %447 = arith.truncf %413 : vector<8x32xf32> to vector<8x32xbf16>
    %c0_130 = arith.constant 0 : index
    %c0_131 = arith.constant 0 : index
    %448 = vector.load %arg7[%c0_130, %c0_131] : memref<32x128xbf16, #tpu.memory_space<vmem>>, vector<32x128xbf16>
    %cst_132 = arith.constant dense<0.000000e+00> : vector<8x128xf32>
    %449 = tpu.matmul %447, %448, %cst_132 {dimension_numbers = #tpu.dot_dimension_numbers<[1], [0], [0], [1], [0, 0, 1, 1], [], []>} : vector<8x32xbf16>, vector<32x128xbf16>, vector<8x128xf32> -> vector<8x128xf32>
    %450 = arith.truncf %446 : vector<8x32xf32> to vector<8x32xbf16>
    %c0_133 = arith.constant 0 : index
    %c0_134 = arith.constant 0 : index
    %451 = vector.load %arg6[%c0_133, %c0_134] : memref<32x128xbf16, #tpu.memory_space<vmem>>, vector<32x128xbf16>
    %cst_135 = arith.constant dense<0.000000e+00> : vector<8x128xf32>
    %452 = tpu.matmul %450, %451, %cst_135 {dimension_numbers = #tpu.dot_dimension_numbers<[1], [0], [0], [1], [0, 0, 1, 1], [], []>} : vector<8x32xbf16>, vector<32x128xbf16>, vector<8x128xf32> -> vector<8x128xf32>
    %453 = arith.addf %449, %452 : vector<8x128xf32>
    %454 = arith.addf %453, %13 : vector<8x128xf32>
    %455 = vector.extract_strided_slice %454 {offsets = [0, 0], sizes = [8, 32], strides = [1, 1]} : vector<8x128xf32> to vector<8x32xf32>
    %456 = arith.negf %455 : vector<8x32xf32>
    %457 = math.exp %456 : vector<8x32xf32>
    %cst_136 = arith.constant 1.000000e+00 : f32
    %458 = vector.broadcast %cst_136 : f32 to vector<8x32xf32>
    %459 = arith.addf %458, %457 : vector<8x32xf32>
    %460 = arith.divf %458, %459 : vector<8x32xf32>
    %461 = vector.extract_strided_slice %454 {offsets = [0, 32], sizes = [8, 32], strides = [1, 1]} : vector<8x128xf32> to vector<8x32xf32>
    %462 = arith.negf %461 : vector<8x32xf32>
    %463 = math.exp %462 : vector<8x32xf32>
    %cst_137 = arith.constant 1.000000e+00 : f32
    %464 = vector.broadcast %cst_137 : f32 to vector<8x32xf32>
    %465 = arith.addf %464, %463 : vector<8x32xf32>
    %466 = arith.divf %464, %465 : vector<8x32xf32>
    %467 = vector.extract_strided_slice %454 {offsets = [0, 64], sizes = [8, 32], strides = [1, 1]} : vector<8x128xf32> to vector<8x32xf32>
    %468 = math.tanh %467 : vector<8x32xf32>
    %469 = vector.extract_strided_slice %454 {offsets = [0, 96], sizes = [8, 32], strides = [1, 1]} : vector<8x128xf32> to vector<8x32xf32>
    %470 = arith.negf %469 : vector<8x32xf32>
    %471 = math.exp %470 : vector<8x32xf32>
    %cst_138 = arith.constant 1.000000e+00 : f32
    %472 = vector.broadcast %cst_138 : f32 to vector<8x32xf32>
    %473 = arith.addf %472, %471 : vector<8x32xf32>
    %474 = arith.divf %472, %473 : vector<8x32xf32>
    %475 = arith.mulf %466, %411 : vector<8x32xf32>
    %476 = arith.mulf %460, %468 : vector<8x32xf32>
    %477 = arith.addf %475, %476 : vector<8x32xf32>
    %478 = math.tanh %477 : vector<8x32xf32>
    %479 = arith.mulf %474, %478 : vector<8x32xf32>
    %c7_i32 = arith.constant 7 : i32
    %c8_i32_139 = arith.constant 8 : i32
    %480 = arith.muli %c7_i32, %c8_i32_139 : i32
    %481 = tpu.assume_multiple %480, 8 : i32
    %482 = arith.index_cast %481 : i32 to index
    %c0_140 = arith.constant 0 : index
    %483 = vector.load %arg12[%482, %c0_140] : memref<64x128xf32, #tpu.memory_space<vmem>>, vector<8x128xf32>
    %484 = arith.truncf %446 : vector<8x32xf32> to vector<8x32xbf16>
    %c0_141 = arith.constant 0 : index
    %c0_142 = arith.constant 0 : index
    %485 = vector.load %arg5[%c0_141, %c0_142] : memref<32x128xbf16, #tpu.memory_space<vmem>>, vector<32x128xbf16>
    %cst_143 = arith.constant dense<0.000000e+00> : vector<8x128xf32>
    %486 = tpu.matmul %484, %485, %cst_143 {dimension_numbers = #tpu.dot_dimension_numbers<[1], [0], [0], [1], [0, 0, 1, 1], [], []>} : vector<8x32xbf16>, vector<32x128xbf16>, vector<8x128xf32> -> vector<8x128xf32>
    %487 = arith.addf %483, %486 : vector<8x128xf32>
    %488 = vector.extract_strided_slice %487 {offsets = [0, 0], sizes = [8, 32], strides = [1, 1]} : vector<8x128xf32> to vector<8x32xf32>
    %489 = arith.negf %488 : vector<8x32xf32>
    %490 = math.exp %489 : vector<8x32xf32>
    %cst_144 = arith.constant 1.000000e+00 : f32
    %491 = vector.broadcast %cst_144 : f32 to vector<8x32xf32>
    %492 = arith.addf %491, %490 : vector<8x32xf32>
    %493 = arith.divf %491, %492 : vector<8x32xf32>
    %494 = vector.extract_strided_slice %487 {offsets = [0, 32], sizes = [8, 32], strides = [1, 1]} : vector<8x128xf32> to vector<8x32xf32>
    %495 = arith.negf %494 : vector<8x32xf32>
    %496 = math.exp %495 : vector<8x32xf32>
    %cst_145 = arith.constant 1.000000e+00 : f32
    %497 = vector.broadcast %cst_145 : f32 to vector<8x32xf32>
    %498 = arith.addf %497, %496 : vector<8x32xf32>
    %499 = arith.divf %497, %498 : vector<8x32xf32>
    %500 = vector.extract_strided_slice %487 {offsets = [0, 64], sizes = [8, 32], strides = [1, 1]} : vector<8x128xf32> to vector<8x32xf32>
    %501 = math.tanh %500 : vector<8x32xf32>
    %502 = vector.extract_strided_slice %487 {offsets = [0, 96], sizes = [8, 32], strides = [1, 1]} : vector<8x128xf32> to vector<8x32xf32>
    %503 = arith.negf %502 : vector<8x32xf32>
    %504 = math.exp %503 : vector<8x32xf32>
    %cst_146 = arith.constant 1.000000e+00 : f32
    %505 = vector.broadcast %cst_146 : f32 to vector<8x32xf32>
    %506 = arith.addf %505, %504 : vector<8x32xf32>
    %507 = arith.divf %505, %506 : vector<8x32xf32>
    %508 = arith.mulf %499, %444 : vector<8x32xf32>
    %509 = arith.mulf %493, %501 : vector<8x32xf32>
    %510 = arith.addf %508, %509 : vector<8x32xf32>
    %511 = math.tanh %510 : vector<8x32xf32>
    %512 = arith.mulf %507, %511 : vector<8x32xf32>
    %513 = arith.truncf %479 : vector<8x32xf32> to vector<8x32xbf16>
    %c0_147 = arith.constant 0 : index
    %c0_148 = arith.constant 0 : index
    %514 = vector.load %arg7[%c0_147, %c0_148] : memref<32x128xbf16, #tpu.memory_space<vmem>>, vector<32x128xbf16>
    %cst_149 = arith.constant dense<0.000000e+00> : vector<8x128xf32>
    %515 = tpu.matmul %513, %514, %cst_149 {dimension_numbers = #tpu.dot_dimension_numbers<[1], [0], [0], [1], [0, 0, 1, 1], [], []>} : vector<8x32xbf16>, vector<32x128xbf16>, vector<8x128xf32> -> vector<8x128xf32>
    %516 = arith.truncf %512 : vector<8x32xf32> to vector<8x32xbf16>
    %c0_150 = arith.constant 0 : index
    %c0_151 = arith.constant 0 : index
    %517 = vector.load %arg6[%c0_150, %c0_151] : memref<32x128xbf16, #tpu.memory_space<vmem>>, vector<32x128xbf16>
    %cst_152 = arith.constant dense<0.000000e+00> : vector<8x128xf32>
    %518 = tpu.matmul %516, %517, %cst_152 {dimension_numbers = #tpu.dot_dimension_numbers<[1], [0], [0], [1], [0, 0, 1, 1], [], []>} : vector<8x32xbf16>, vector<32x128xbf16>, vector<8x128xf32> -> vector<8x128xf32>
    %519 = arith.addf %515, %518 : vector<8x128xf32>
    %520 = arith.addf %519, %13 : vector<8x128xf32>
    %521 = vector.extract_strided_slice %520 {offsets = [0, 0], sizes = [8, 32], strides = [1, 1]} : vector<8x128xf32> to vector<8x32xf32>
    %522 = arith.negf %521 : vector<8x32xf32>
    %523 = math.exp %522 : vector<8x32xf32>
    %cst_153 = arith.constant 1.000000e+00 : f32
    %524 = vector.broadcast %cst_153 : f32 to vector<8x32xf32>
    %525 = arith.addf %524, %523 : vector<8x32xf32>
    %526 = arith.divf %524, %525 : vector<8x32xf32>
    %527 = vector.extract_strided_slice %520 {offsets = [0, 32], sizes = [8, 32], strides = [1, 1]} : vector<8x128xf32> to vector<8x32xf32>
    %528 = arith.negf %527 : vector<8x32xf32>
    %529 = math.exp %528 : vector<8x32xf32>
    %cst_154 = arith.constant 1.000000e+00 : f32
    %530 = vector.broadcast %cst_154 : f32 to vector<8x32xf32>
    %531 = arith.addf %530, %529 : vector<8x32xf32>
    %532 = arith.divf %530, %531 : vector<8x32xf32>
    %533 = vector.extract_strided_slice %520 {offsets = [0, 64], sizes = [8, 32], strides = [1, 1]} : vector<8x128xf32> to vector<8x32xf32>
    %534 = math.tanh %533 : vector<8x32xf32>
    %535 = vector.extract_strided_slice %520 {offsets = [0, 96], sizes = [8, 32], strides = [1, 1]} : vector<8x128xf32> to vector<8x32xf32>
    %536 = arith.negf %535 : vector<8x32xf32>
    %537 = math.exp %536 : vector<8x32xf32>
    %cst_155 = arith.constant 1.000000e+00 : f32
    %538 = vector.broadcast %cst_155 : f32 to vector<8x32xf32>
    %539 = arith.addf %538, %537 : vector<8x32xf32>
    %540 = arith.divf %538, %539 : vector<8x32xf32>
    %541 = arith.mulf %532, %477 : vector<8x32xf32>
    %542 = arith.mulf %526, %534 : vector<8x32xf32>
    %543 = arith.addf %541, %542 : vector<8x32xf32>
    %544 = math.tanh %543 : vector<8x32xf32>
    %545 = arith.mulf %540, %544 : vector<8x32xf32>
    %c8_i32_156 = arith.constant 8 : i32
    %c0_157 = arith.constant 0 : index
    %c0_158 = arith.constant 0 : index
    %546 = vector.load %arg13[%c0_157, %c0_158] : memref<8x32xf32, #tpu.memory_space<vmem>>, vector<8x32xf32>
    tpu.vector_store %arg13[%c0_157, %c0_158], %512 {strides = array<i32>} : memref<8x32xf32, #tpu.memory_space<vmem>>, vector<8x32xf32>,
    %c0_159 = arith.constant 0 : index
    %c0_160 = arith.constant 0 : index
    %547 = vector.load %arg14[%c0_159, %c0_160] : memref<8x32xf32, #tpu.memory_space<vmem>>, vector<8x32xf32>
    tpu.vector_store %arg14[%c0_159, %c0_160], %510 {strides = array<i32>} : memref<8x32xf32, #tpu.memory_space<vmem>>, vector<8x32xf32>,
    %c0_161 = arith.constant 0 : index
    %c0_162 = arith.constant 0 : index
    %548 = vector.load %arg15[%c0_161, %c0_162] : memref<8x32xf32, #tpu.memory_space<vmem>>, vector<8x32xf32>
    tpu.vector_store %arg15[%c0_161, %c0_162], %545 {strides = array<i32>} : memref<8x32xf32, #tpu.memory_space<vmem>>, vector<8x32xf32>,
    %c0_163 = arith.constant 0 : index
    %c0_164 = arith.constant 0 : index
    %549 = vector.load %arg16[%c0_163, %c0_164] : memref<8x32xf32, #tpu.memory_space<vmem>>, vector<8x32xf32>
    tpu.vector_store %arg16[%c0_163, %c0_164], %543 {strides = array<i32>} : memref<8x32xf32, #tpu.memory_space<vmem>>, vector<8x32xf32>,
    %c0_i32_165 = arith.constant 0 : i32
    %550 = arith.cmpi eq, %arg1, %c0_i32_165 : i32
    %551 = arith.extui %550 : i1 to i32
    %c0_i32_166 = arith.constant 0 : i32
    %552 = arith.cmpi ne, %551, %c0_i32_166 : i32
    scf.if %552 {
      %553 = arith.truncf %545 : vector<8x32xf32> to vector<8x32xbf16>
      %c0_167 = arith.constant 0 : index
      %c0_168 = arith.constant 0 : index
      %554 = vector.load %arg9[%c0_167, %c0_168] : memref<32x128xbf16, #tpu.memory_space<vmem>>, vector<32x128xbf16>
      %cst_169 = arith.constant dense<0.000000e+00> : vector<8x128xf32>
      %555 = tpu.matmul %553, %554, %cst_169 {dimension_numbers = #tpu.dot_dimension_numbers<[1], [0], [0], [1], [0, 0, 1, 1], [], []>} : vector<8x32xbf16>, vector<32x128xbf16>, vector<8x128xf32> -> vector<8x128xf32>
      %c0_170 = arith.constant 0 : index
      %c0_171 = arith.constant 0 : index
      %556 = vector.load %arg10[%c0_170, %c0_171] : memref<1x128xf32, #tpu.memory_space<vmem>>, vector<1x128xf32>
      %557 = vector.broadcast %556 : vector<1x128xf32> to vector<8x128xf32>
      %558 = arith.addf %555, %557 : vector<8x128xf32>
      %c0_172 = arith.constant 0 : index
      %c0_173 = arith.constant 0 : index
      %559 = vector.load %arg11[%c0_172, %c0_173] : memref<8x128xf32, #tpu.memory_space<vmem>>, vector<8x128xf32>
      tpu.vector_store %arg11[%c0_172, %c0_173], %558 {strides = array<i32>} : memref<8x128xf32, #tpu.memory_space<vmem>>, vector<8x128xf32>,
    } else {
    }
    return
  }
  func.func @transform_0(%arg0: i32, %arg1: i32) -> (i32, i32, i32, i32) {
    %c0_i32 = arith.constant 0 : i32
    %c0_i32_0 = arith.constant 0 : i32
    %c0_i32_1 = arith.constant 0 : i32
    return %arg0, %arg1, %c0_i32, %c0_i32_0 : i32, i32, i32, i32
  }
  func.func @transform_1(%arg0: i32, %arg1: i32) -> (i32, i32) {
    %c0_i32 = arith.constant 0 : i32
    %c0_i32_0 = arith.constant 0 : i32
    %c0_i32_1 = arith.constant 0 : i32
    return %c0_i32, %c0_i32_0 : i32, i32
  }
  func.func @transform_2(%arg0: i32, %arg1: i32) -> (i32, i32) {
    %c0_i32 = arith.constant 0 : i32
    %c0_i32_0 = arith.constant 0 : i32
    %c0_i32_1 = arith.constant 0 : i32
    return %c0_i32, %c0_i32_0 : i32, i32
  }
  func.func @transform_3(%arg0: i32, %arg1: i32) -> (i32, i32) {
    %c0_i32 = arith.constant 0 : i32
    %c0_i32_0 = arith.constant 0 : i32
    %c0_i32_1 = arith.constant 0 : i32
    return %c0_i32, %c0_i32_0 : i32, i32
  }
  func.func @transform_4(%arg0: i32, %arg1: i32) -> (i32, i32) {
    %c0_i32 = arith.constant 0 : i32
    %c0_i32_0 = arith.constant 0 : i32
    %c0_i32_1 = arith.constant 0 : i32
    return %c0_i32, %c0_i32_0 : i32, i32
  }
  func.func @transform_5(%arg0: i32, %arg1: i32) -> (i32, i32) {
    %c0_i32 = arith.constant 0 : i32
    %c0_i32_0 = arith.constant 0 : i32
    %c0_i32_1 = arith.constant 0 : i32
    return %c0_i32, %c0_i32_0 : i32, i32
  }
  func.func @transform_6(%arg0: i32, %arg1: i32) -> (i32, i32) {
    %c0_i32 = arith.constant 0 : i32
    %c0_i32_0 = arith.constant 0 : i32
    %c0_i32_1 = arith.constant 0 : i32
    return %c0_i32, %c0_i32_0 : i32, i32
  }
  func.func @transform_7(%arg0: i32, %arg1: i32) -> (i32, i32) {
    %c0_i32 = arith.constant 0 : i32
    %c0_i32_0 = arith.constant 0 : i32
    %c0_i32_1 = arith.constant 0 : i32
    return %c0_i32, %c0_i32_0 : i32, i32
  }
  func.func @transform_8(%arg0: i32, %arg1: i32) -> (i32, i32) {
    %c0_i32 = arith.constant 0 : i32
    %c0_i32_0 = arith.constant 0 : i32
    %c0_i32_1 = arith.constant 0 : i32
    return %c0_i32, %c0_i32_0 : i32, i32
  }
  func.func @transform_9(%arg0: i32, %arg1: i32) -> (i32, i32) {
    %c0_i32 = arith.constant 0 : i32
    %c0_i32_0 = arith.constant 0 : i32
    return %arg0, %c0_i32 : i32, i32
  }
}

</mosaic_0001>

<bundles_post_ra>
// kernel: tpu_custom_call.1
= control target key start
LH: loop header
LB: loop body
LE: loop exit
PB: predicated region body
PF: predicated region fallthrough
CT: control target
= control target key end

     0   :  { %14 = vsyncpa [#allocation8], 0  ;;  %s2052_s0 = inlined_call_operand.vmem [shape: bf16[1,1,64,16], index: 0, kind: input, shape index: {}]   ;;  %s2053_s1 = inlined_call_operand.vmem [shape: bf16[16,128], index: 1, kind: input, shape index: {}]   ;;  %s2054_s2 = inlined_call_operand.vmem [shape: f32[1,128], index: 2, kind: input, shape index: {}]   ;;  %s2055_s3 = inlined_call_operand.vmem [shape: bf16[32,128], index: 3, kind: input, shape index: {}]   ;;  %s2056_s4 = inlined_call_operand.vmem [shape: bf16[32,128], index: 4, kind: input, shape index: {}]   ;;  %s2057_s5 = inlined_call_operand.hbm [shape: bf16[32,128], index: 5, kind: input, shape index: {}]   ;;  %s2058_s6 = inlined_call_operand.vmem [shape: f32[1,128], index: 6, kind: input, shape index: {}]   ;;  %s2059_s7 = inlined_call_operand.hbm [shape: bf16[32,128], index: 7, kind: input, shape index: {}]   ;;  %s2060_s8 = inlined_call_operand.vmem [shape: f32[1,128], index: 8, kind: input, shape index: {}]   ;;  %s2061_s9 = inlined_call_operand.hbm [shape: f32[8,128], index: 9, kind: output, shape index: {}]  }
   0x1   :  { %15 = vsyncpa [#allocation11], 0 }
   0x2   :  { %16 = vsyncpa [#allocation9], 0  ;;  %s31_s11 = sshll.u32 %s2057_s5, 4  ;;  %s1689_s12 = smov [#allocation7]   ;;  %s32_s11 = int_to_ptr.hbm [resolvable:$true] %s31_s11 }
   0x3   :  { %s33_s13 = sshll.u32 %s1689_s12, 4  ;;  %s46_s16 = sshll.u32 %s2059_s7, 4  ;;  %s34_s13 = int_to_ptr.vmem [resolvable:$true] %s33_s13  ;;  %s47_s16 = int_to_ptr.hbm [resolvable:$true] %s46_s16 }
   0x4   :  { %s1690_s17 = smov 64   ;;  %s1691_s18 = smov 4  }
   0x5   :  { %39 = dma.hbm_to_vmem [thread:$0]  %s32_s11, 256, %s34_s13, [#allocation8], %s1690_s17, %s1690_s17, %s1691_s18  }
   0x6   :  { %s1692_s19 = smov [#allocation10]  }
   0x7   :  { %s48_s20 = sshll.u32 %s1692_s19, 4  ;;  %s49_s20 = int_to_ptr.vmem [resolvable:$true] %s48_s20 }
   0x8   :  { %54 = dma.hbm_to_vmem [thread:$0]  %s47_s16, 256, %s49_s20, [#allocation11], %s1690_s17, %s1690_s17, %s1691_s18  }
   0x9   :  { %1683 = dma.done.wait [#allocation8], 256  }
   0xa   :  { %1684 = vsyncadd [#allocation8], 4294967040 }
   0xb   :  { %1685 = dma.done.wait [#allocation11], 256  }
   0xc   :  { %1686 = vsyncadd [#allocation11], 4294967040  ;;  %vm70_vm0 = vcmask 261120   ;;  %v1693_v0 = vmov 0.0   ;;  %v1461_v1 = vld [vmem:[%s2053_s1] sm:$0xff]  ;;  %v1767_v2 = vld [vmem:[%s2055_s3 + $0x8] sm:$0xff] }
   0xd   :  { %71 = vst.msk [vmem:[#allocation3] sm:$0xff] %vm70_vm0, %v1693_v0  ;;  %v1457_v3 = vld [vmem:[%s2052_s0] sm:$0xff]  ;;  %135 = vmatpush.bf16.msra.mxu0 %v1461_v1  ;;  %201 = vmatpush.bf16.msra.mxu1 %v1767_v2  ;;  %vm115_vm1 = vcmask 130048   ;;  %s1694_s27 = smov 32   ;;  %v1803_v35 = vld [vmem:[%s2056_s4 + $0x8] sm:$0xff]  ;;  %s1696_s7 = smov [#allocation12]  }
   0xe   :  { %72 = vst.msk [vmem:[#allocation4] sm:$0xff] %vm70_vm0, %v1693_v0  ;;  %v1775_v4 = vld [vmem:[%s2055_s3] sm:$0xff]  ;;  %v1805_v36 = vld [vmem:[#allocation7 + $0x8] sm:$0xff]  ;;  %284 = vmatpush.bf16.msra.mxu2 %v1803_v35  ;;  %s1347_s21 = sshll.u32 %s1696_s7, 4  ;;  %s1349_s24 = sshll.u32 %s2061_s9, 4  ;;  %s1348_s21 = int_to_ptr.vmem [resolvable:$true] %s1347_s21  ;;  %s1350_s24 = int_to_ptr.hbm [resolvable:$true] %s1349_s24 }
   0xf   :  { %73 = vst.msk [vmem:[#allocation5] sm:$0xff] %vm70_vm0, %v1693_v0  ;;  %v1790_v7 = vld [vmem:[%s2054_s2] ss:$0 sm:$0xff]  ;;  %312 = vmatpush.bf16.msra.mxu3 %v1805_v36 }
  0x10   :  { %74 = vst.msk [vmem:[#allocation6] sm:$0xff] %vm70_vm0, %v1693_v0  ;;  %1380 = vmatmul.msk.bf16.vlgmr.msra.gmra.mxu0 %vm115_vm1, %v1457_v3  ;;  %v1812_v37 = vld [vmem:[%s2056_s4] sm:$0xff] }
  0x11   :  { %762 = vmatpush.bf16.msrb.mxu0 %v1767_v2  ;;  %202 = vmatpush.bf16.msra.mxu1 %v1775_v4  ;;  %v1814_v38 = vld [vmem:[#allocation7] sm:$0xff] }
  0x12   :  { %285 = vmatpush.bf16.msra.mxu2 %v1812_v37  ;;  %v1839_v52 = vld [vmem:[%s2058_s6] ss:$0 sm:$0xff] }
  0x13   :  { %313 = vmatpush.bf16.msra.mxu3 %v1814_v38 }
  0x14   :  { %v169_v5 = vld [vmem:[#allocation3] sm:$0xff] }
  0x15   :  { %v174_v6 = vpack.c.bf16 %v169_v5, %v169_v5  ;;  %369 = vmatpush.bf16.msrb.mxu1 %v1767_v2  ;;  %763 = vmatpush.bf16.msrb.mxu0 %v1775_v4  ;;  %v170_v14 = vld [vmem:[#allocation4] sm:$0xff] }
  0x16   :  { %428 = vmatpush.bf16.msrb.mxu2 %v1803_v35  ;;  %v171_v42 = vld [vmem:[#allocation5] sm:$0xff] }
  0x17   :  { %1392 = vmatmul.msk.bf16.vlgmr.msra.gmra.mxu1 %vm70_vm0, %v174_v6  ;;  %447 = vmatpush.bf16.msrb.mxu3 %v1805_v36  ;;  %v250_v43 = vpack.c.bf16 %v171_v42, %v171_v42  ;;  %v172_v44 = vld [vmem:[#allocation6] sm:$0xff] }
  0x19   :  { %370 = vmatpush.bf16.msrb.mxu1 %v1775_v4  ;;  %952 = vmatpush.bf16.msra.mxu0 %v1803_v35 }
  0x1a   :  { %429 = vmatpush.bf16.msrb.mxu2 %v1812_v37  ;;  %1411 = vmatmul.msk.bf16.vlgmr.msra.gmra.mxu3 %vm70_vm0, %v250_v43 }
  0x1b   :  { %448 = vmatpush.bf16.msrb.mxu3 %v1814_v38 }
  0x1d   :  { %500 = vmatpush.bf16.msra.mxu1 %v1767_v2  ;;  %953 = vmatpush.bf16.msra.mxu0 %v1812_v37 }
  0x1f   :  { %578 = vmatpush.bf16.msra.mxu3 %v1805_v36 }
  0x21   :  { %501 = vmatpush.bf16.msra.mxu1 %v1775_v4 }
  0x23   :  { %579 = vmatpush.bf16.msra.mxu3 %v1814_v38 }
  0x8d   :  { %v137_v8 = vpop.f32.mrf.mxu0 }
  0x8e   :  { %v138_v9 = vadd.f32 %v1790_v7, %v137_v8 }
  0x94   :  { %v204_v10 = vpop.f32.mrf.mxu1 }
  0x95   :  { %v208_v11 = vadd.f32 %v204_v10, %v138_v9  ;;  %v139_v48 = vpop.f32.mrf.mxu0 }
  0x96   :  { %v140_v49 = vadd.f32 %v1790_v7, %v139_v48 }
  0x97   :  { %1481 = vtanh.f32 %v208_v11  ;;  %v1393_v15 = vmul.f32 -1.442695, %v208_v11 }
  0x99   :  { %1483 = vpow2.f32 %v1393_v15 }
  0x9c   :  { %v206_v12 = vpop.f32.mrf.mxu1 }
  0x9d   :  { %v1482_v13 = vpop.eup %1481  ;;  %v315_v46 = vpop.f32.mrf.mxu3 }
  0x9e   :  { %235 = vrot.lane.b32.xlu0 %v1482_v13, %s1690_s17 }
  0x9f   :  { %v1484_v16 = vpop.eup %1483 }
  0xa0   :  { %v212_v17 = vadd.f32 1.0, %v1484_v16 }
  0xa2   :  { %1485 = vrcp.f32 %v212_v17  ;;  %v224_v23 = vand.u32 2147483648, %v212_v17  ;;  %vm218_vm3 = vweird.f32 %v212_v17  ;;  %v222_v24 = vand.u32 2147483647, %v212_v17 }
  0xa4   :  { %v225_v26 = vor.u32 1.1754944e-38, %v224_v23  ;;  %vm223_vm5 = vcmp.eq.f32.partialorder %v222_v24, 8.507059e+37 }
  0xa5   :  { %v317_v47 = vpop.f32.mrf.mxu3 }
  0xa6   :  { %230 = vrot.lane.b32.xlu0 %v170_v14, %s1694_s27 }
  0xa8   :  { %v1486_v18 = vpop.eup %1485 }
  0xa9   :  { %v214_v19 = vmul.f32 %v1486_v18, %v212_v17  ;;  %vm219_vm2 = vweird.f32 %v1486_v18 }
  0xaa   :  { %vm220_vm4 = vmor %vm218_vm3, %vm219_vm2 }
  0xab   :  { %v215_v20 = vsub.f32 1.0, %v214_v19 }
  0xad   :  { %v216_v21 = vmul.f32 %v1486_v18, %v215_v20 }
  0xaf   :  { %v217_v22 = vadd.f32 %v1486_v18, %v216_v21 }
  0xb1   :  { %v221_v25 = vsel %vm220_vm4, %v1486_v18, %v217_v22 }
  0xb2   :  { %v226_v28 = vsel %vm223_vm5, %v225_v26, %v221_v25 }
 0x110   :  { %v236_v27 = vpop.permute.xlu0 %235 }
 0x111   :  { %v238_v29 = vmul.f32 %v236_v27, %v226_v28 }
 0x113   :  { %240 = vrot.lane.b32.xlu1 %v238_v29, %s1694_s27 }
 0x118   :  { %v231_v30 = vpop.permute.xlu0 %230 }
 0x119   :  { %v233_v31 = vmul.f32 %v231_v30, %v226_v28 }
 0x185   :  { %v241_v32 = vpop.permute.xlu1 %240 }
 0x186   :  { %v1796_v33 = vadd.f32 %v241_v32, %v233_v31 }
 0x188   :  { %1487 = vtanh.f32 %v1796_v33 }
 0x18e   :  { %v1488_v34 = vpop.eup %1487 }
 0x18f   :  { %246 = vrot.lane.b32.xlu1 %v1488_v34, %s1690_s17 }
 0x197   :  { %341 = vrot.lane.b32.xlu1 %v172_v44, %s1694_s27 }
 0x201   :  { %v247_v39 = vpop.permute.xlu1 %246 }
 0x202   :  { %v249_v40 = vmul.f32 %v247_v39, %v226_v28 }
 0x204   :  { %v255_v41 = vpack.c.bf16 %v249_v40, %v249_v40 }
 0x206   :  { %261 = vrot.lane.b32.xlu2 %v255_v41, %s1694_s27 }
 0x209   :  { %v342_v29 = vpop.permute.xlu1 %341 }
 0x260   :  { %v262_v45 = vpop.permute.xlu2 %261 }
 0x261   :  { %1402 = vmatmul.msk.bf16.vlgmr.msra.gmra.mxu2 %vm70_vm0, %v262_v45  ;;  %1413 = vmatmul.msk.bf16.vlgmr.msrb.gmra.mxu1 %vm70_vm0, %v262_v45 }
 0x262   :  { %559 = vmatpush.bf16.msra.mxu2 %v1803_v35  ;;  %631 = vmatpush.bf16.msrb.mxu1 %v1767_v2 }
 0x266   :  { %560 = vmatpush.bf16.msra.mxu2 %v1812_v37  ;;  %632 = vmatpush.bf16.msrb.mxu1 %v1775_v4 }
 0x2de   :  { %v372_v50 = vpop.f32.mrf.mxu1 }
 0x2df   :  { %v376_v51 = vadd.f32 %v372_v50, %v140_v49 }
 0x2e1   :  { %1489 = vtanh.f32 %v376_v51  ;;  %v1414_v63 = vmul.f32 -1.442695, %v376_v51 }
 0x2e4   :  { %v287_v53 = vpop.f32.mrf.mxu2 }
 0x2e5   :  { %v316_v54 = vadd.f32 %v315_v46, %v287_v53 }
 0x2e6   :  { %v374_v55 = vpop.f32.mrf.mxu1 }
 0x2e7   :  { %v1490_v56 = vpop.eup %1489  ;;  %v319_v57 = vadd.f32 %v1839_v52, %v316_v54 }
 0x2e8   :  { %399 = vrot.lane.b32.xlu0 %v1490_v56, %s1690_s17 }
 0x2e9   :  { %1491 = vtanh.f32 %v319_v57  ;;  %v1412_v60 = vmul.f32 -1.442695, %v319_v57 }
 0x2eb   :  { %1493 = vpow2.f32 %v1412_v60 }
 0x2ec   :  { %v289_v58 = vpop.f32.mrf.mxu2 }
 0x2ef   :  { %v1492_v59 = vpop.eup %1491 }
 0x2f0   :  { %346 = vrot.lane.b32.xlu2 %v1492_v59, %s1690_s17 }
 0x2f1   :  { %v1494_v61 = vpop.eup %1493 }
 0x2f2   :  { %v323_v62 = vadd.f32 1.0, %v1494_v61 }
 0x2f4   :  { %1495 = vrcp.f32 %v323_v62  ;;  %v335_v11 = vand.u32 2147483648, %v323_v62  ;;  %vm329_vm7 = vweird.f32 %v323_v62  ;;  %v333_v12 = vand.u32 2147483647, %v323_v62 }
 0x2f5   :  { %1497 = vpow2.f32 %v1414_v63 }
 0x2f6   :  { %v336_v15 = vor.u32 1.1754944e-38, %v335_v11  ;;  %vm334_vm9 = vcmp.eq.f32.partialorder %v333_v12, 8.507059e+37 }
 0x2fa   :  { %v1496_v0 = vpop.eup %1495 }
 0x2fb   :  { %v1498_v1 = vpop.eup %1497  ;;  %v325_v3 = vmul.f32 %v1496_v0, %v323_v62  ;;  %vm330_vm6 = vweird.f32 %v1496_v0 }
 0x2fc   :  { %v380_v5 = vadd.f32 1.0, %v1498_v1  ;;  %vm331_vm8 = vmor %vm329_vm7, %vm330_vm6 }
 0x2fd   :  { %v326_v6 = vsub.f32 1.0, %v325_v3 }
 0x2fe   :  { %1499 = vrcp.f32 %v380_v5  ;;  %v392_v22 = vand.u32 2147483648, %v380_v5  ;;  %vm386_vm11 = vweird.f32 %v380_v5  ;;  %v390_v23 = vand.u32 2147483647, %v380_v5 }
 0x2ff   :  { %v327_v8 = vmul.f32 %v1496_v0, %v326_v6 }
 0x300   :  { %v393_v25 = vor.u32 1.1754944e-38, %v392_v22  ;;  %vm391_vm13 = vcmp.eq.f32.partialorder %v390_v23, 8.507059e+37 }
 0x301   :  { %v328_v9 = vadd.f32 %v1496_v0, %v327_v8 }
 0x303   :  { %v332_v13 = vsel %vm331_vm8, %v1496_v0, %v328_v9 }
 0x304   :  { %v1500_v10 = vpop.eup %1499  ;;  %v337_v16 = vsel %vm334_vm9, %v336_v15, %v332_v13 }
 0x305   :  { %v382_v14 = vmul.f32 %v1500_v10, %v380_v5  ;;  %vm387_vm10 = vweird.f32 %v1500_v10  ;;  %v344_v30 = vmul.f32 %v342_v29, %v337_v16 }
 0x306   :  { %vm388_vm12 = vmor %vm386_vm11, %vm387_vm10 }
 0x307   :  { %v383_v19 = vsub.f32 1.0, %v382_v14 }
 0x309   :  { %v384_v20 = vmul.f32 %v1500_v10, %v383_v19 }
 0x30b   :  { %v385_v21 = vadd.f32 %v1500_v10, %v384_v20 }
 0x30d   :  { %v389_v24 = vsel %vm388_vm12, %v1500_v10, %v385_v21 }
 0x30e   :  { %v394_v27 = vsel %vm391_vm13, %v393_v25, %v389_v24 }
 0x30f   :  { %v397_v39 = vmul.f32 %v394_v27, %v1796_v33  ;;  %v1458_v33 = vld [vmem:[%s2052_s0 + $0x8] sm:$0xff] }
 0x310   :  { %1381 = vmatmul.msk.bf16.gmra.mxu0 %vm115_vm1, %v1458_v33 }
 0x34a   :  { %v347_v17 = vpop.permute.xlu2 %346 }
 0x34b   :  { %v349_v18 = vmul.f32 %v347_v17, %v337_v16 }
 0x34d   :  { %351 = vrot.lane.b32.xlu2 %v349_v18, %s1694_s27 }
 0x35a   :  { %v400_v26 = vpop.permute.xlu0 %399 }
 0x35b   :  { %v402_v28 = vmul.f32 %v400_v26, %v394_v27 }
 0x35d   :  { %404 = vrot.lane.b32.xlu0 %v402_v28, %s1694_s27 }
 0x38d   :  { %v142_v53 = vpop.f32.mrf.mxu0 }
 0x38e   :  { %v143_v54 = vadd.f32 %v1790_v7, %v142_v53 }
 0x3a7   :  { %v352_v31 = vpop.permute.xlu2 %351 }
 0x3a8   :  { %v1846_v32 = vadd.f32 %v352_v31, %v344_v30 }
 0x3aa   :  { %1501 = vtanh.f32 %v1846_v32 }
 0x3b0   :  { %v1502_v34 = vpop.eup %1501 }
 0x3b1   :  { %357 = vrot.lane.b32.xlu1 %v1502_v34, %s1690_s17 }
 0x3cf   :  { %v405_v40 = vpop.permute.xlu0 %404 }
 0x3d0   :  { %v1851_v41 = vadd.f32 %v405_v40, %v397_v39 }
 0x3d2   :  { %1503 = vtanh.f32 %v1851_v41 }
 0x3d8   :  { %v1504_v42 = vpop.eup %1503 }
 0x3d9   :  { %410 = vrot.lane.b32.xlu2 %v1504_v42, %s1690_s17 }
 0x423   :  { %v358_v43 = vpop.permute.xlu1 %357 }
 0x424   :  { %v360_v44 = vmul.f32 %v358_v43, %v337_v16 }
 0x426   :  { %v414_v45 = vpack.c.bf16 %v360_v44, %v360_v44 }
 0x428   :  { %436 = vrot.lane.b32.xlu1 %v414_v45, %s1694_s27 }
 0x433   :  { %v411_v46 = vpop.permute.xlu2 %410 }
 0x434   :  { %v413_v47 = vmul.f32 %v411_v46, %v394_v27 }
 0x436   :  { %v415_v48 = vpack.c.bf16 %v413_v47, %v413_v47 }
 0x438   :  { %417 = vrot.lane.b32.xlu0 %v415_v48, %s1694_s27 }
 0x49a   :  { %v437_v49 = vpop.permute.xlu1 %436 }
 0x49b   :  { %1416 = vmatmul.msk.bf16.vlgmr.msrb.gmra.mxu3 %vm70_vm0, %v437_v49 }
 0x49c   :  { %709 = vmatpush.bf16.msrb.mxu3 %v1805_v36 }
 0x4a0   :  { %710 = vmatpush.bf16.msrb.mxu3 %v1814_v38 }
 0x4aa   :  { %v418_v50 = vpop.permute.xlu0 %417 }
 0x4ab   :  { %1415 = vmatmul.msk.bf16.vlgmr.msrb.gmra.mxu2 %vm70_vm0, %v418_v50  ;;  %1418 = vmatmul.msk.bf16.vlgmr.msra.gmra.mxu1 %vm70_vm0, %v418_v50 }
 0x4ac   :  { %690 = vmatpush.bf16.msrb.mxu2 %v1803_v35  ;;  %821 = vmatpush.bf16.msra.mxu1 %v1803_v35 }
 0x4b0   :  { %691 = vmatpush.bf16.msrb.mxu2 %v1812_v37  ;;  %822 = vmatpush.bf16.msra.mxu1 %v1812_v37 }
 0x51e   :  { %v450_v51 = vpop.f32.mrf.mxu3 }
 0x526   :  { %v452_v55 = vpop.f32.mrf.mxu3 }
 0x527   :  { %v144_v55 = vpop.f32.mrf.mxu0 }
 0x528   :  { %v503_v56 = vpop.f32.mrf.mxu1 }
 0x529   :  { %v507_v57 = vadd.f32 %v503_v56, %v143_v54  ;;  %v145_v56 = vadd.f32 %v1790_v7, %v144_v55 }
 0x52b   :  { %1505 = vtanh.f32 %v507_v57  ;;  %v1419_v6 = vmul.f32 -1.442695, %v507_v57 }
 0x52e   :  { %v431_v58 = vpop.f32.mrf.mxu2 }
 0x52f   :  { %v451_v59 = vadd.f32 %v450_v51, %v431_v58 }
 0x530   :  { %v505_v60 = vpop.f32.mrf.mxu1 }
 0x531   :  { %v1506_v61 = vpop.eup %1505  ;;  %v454_v62 = vadd.f32 %v1839_v52, %v451_v59 }
 0x532   :  { %530 = vrot.lane.b32.xlu0 %v1506_v61, %s1690_s17 }
 0x533   :  { %1507 = vtanh.f32 %v454_v62  ;;  %v1417_v1 = vmul.f32 -1.442695, %v454_v62 }
 0x535   :  { %1509 = vpow2.f32 %v1417_v1 }
 0x536   :  { %v433_v63 = vpop.f32.mrf.mxu2 }
 0x539   :  { %v1508_v0 = vpop.eup %1507 }
 0x53a   :  { %477 = vrot.lane.b32.xlu2 %v1508_v0, %s1690_s17 }
 0x53b   :  { %v1510_v3 = vpop.eup %1509 }
 0x53c   :  { %v458_v5 = vadd.f32 1.0, %v1510_v3 }
 0x53e   :  { %1511 = vrcp.f32 %v458_v5  ;;  %v470_v16 = vand.u32 2147483648, %v458_v5  ;;  %vm464_vm15 = vweird.f32 %v458_v5  ;;  %v468_v17 = vand.u32 2147483647, %v458_v5 }
 0x53f   :  { %1513 = vpow2.f32 %v1419_v6 }
 0x540   :  { %v471_v20 = vor.u32 1.1754944e-38, %v470_v16  ;;  %vm469_vm3 = vcmp.eq.f32.partialorder %v468_v17, 8.507059e+37 }
 0x544   :  { %v1512_v8 = vpop.eup %1511 }
 0x545   :  { %v1514_v9 = vpop.eup %1513  ;;  %v460_v10 = vmul.f32 %v1512_v8, %v458_v5  ;;  %vm465_vm14 = vweird.f32 %v1512_v8 }
 0x546   :  { %v511_v11 = vadd.f32 1.0, %v1514_v9  ;;  %vm466_vm2 = vmor %vm464_vm15, %vm465_vm14 }
 0x547   :  { %v461_v12 = vsub.f32 1.0, %v460_v10 }
 0x548   :  { %1515 = vrcp.f32 %v511_v11  ;;  %v523_v27 = vand.u32 2147483648, %v511_v11  ;;  %vm517_vm5 = vweird.f32 %v511_v11  ;;  %v521_v28 = vand.u32 2147483647, %v511_v11 }
 0x549   :  { %v462_v13 = vmul.f32 %v1512_v8, %v461_v12 }
 0x54a   :  { %v524_v30 = vor.u32 1.1754944e-38, %v523_v27  ;;  %vm522_vm7 = vcmp.eq.f32.partialorder %v521_v28, 8.507059e+37 }
 0x54b   :  { %v463_v14 = vadd.f32 %v1512_v8, %v462_v13 }
 0x54d   :  { %v467_v18 = vsel %vm466_vm2, %v1512_v8, %v463_v14 }
 0x54e   :  { %v1516_v15 = vpop.eup %1515  ;;  %v472_v22 = vsel %vm469_vm3, %v471_v20, %v467_v18 }
 0x54f   :  { %v513_v19 = vmul.f32 %v1516_v15, %v511_v11  ;;  %vm518_vm4 = vweird.f32 %v1516_v15  ;;  %v475_v44 = vmul.f32 %v472_v22, %v1846_v32 }
 0x550   :  { %vm519_vm6 = vmor %vm517_vm5, %vm518_vm4 }
 0x551   :  { %v514_v24 = vsub.f32 1.0, %v513_v19 }
 0x553   :  { %v515_v25 = vmul.f32 %v1516_v15, %v514_v24 }
 0x555   :  { %v516_v26 = vadd.f32 %v1516_v15, %v515_v25 }
 0x557   :  { %v520_v29 = vsel %vm519_vm6, %v1516_v15, %v516_v26 }
 0x558   :  { %v525_v34 = vsel %vm522_vm7, %v524_v30, %v520_v29 }
 0x559   :  { %v528_v40 = vmul.f32 %v525_v34, %v1851_v41 }
 0x594   :  { %v478_v21 = vpop.permute.xlu2 %477 }
 0x595   :  { %v480_v23 = vmul.f32 %v478_v21, %v472_v22 }
 0x597   :  { %482 = vrot.lane.b32.xlu1 %v480_v23, %s1694_s27 }
 0x5a4   :  { %v531_v31 = vpop.permute.xlu0 %530 }
 0x5a5   :  { %v533_v39 = vmul.f32 %v531_v31, %v525_v34 }
 0x5a7   :  { %535 = vrot.lane.b32.xlu2 %v533_v39, %s1694_s27 }
 0x601   :  { %v536_v42 = vpop.permute.xlu2 %535 }
 0x602   :  { %v1877_v43 = vadd.f32 %v536_v42, %v528_v40 }
 0x604   :  { %1517 = vtanh.f32 %v1877_v43 }
 0x609   :  { %v483_v45 = vpop.permute.xlu1 %482 }
 0x60a   :  { %v1518_v46 = vpop.eup %1517  ;;  %v1881_v47 = vadd.f32 %v483_v45, %v475_v44 }
 0x60b   :  { %541 = vrot.lane.b32.xlu1 %v1518_v46, %s1690_s17 }
 0x60c   :  { %1519 = vtanh.f32 %v1881_v47 }
 0x612   :  { %v1520_v48 = vpop.eup %1519 }
 0x613   :  { %488 = vrot.lane.b32.xlu0 %v1520_v48, %s1690_s17 }
 0x67d   :  { %v542_v33 = vpop.permute.xlu1 %541 }
 0x67e   :  { %v544_v41 = vmul.f32 %v542_v33, %v525_v34 }
 0x680   :  { %v546_v49 = vpack.c.bf16 %v544_v41, %v544_v41 }
 0x682   :  { %548 = vrot.lane.b32.xlu2 %v546_v49, %s1694_s27 }
 0x685   :  { %v489_v50 = vpop.permute.xlu0 %488 }
 0x686   :  { %v491_v51 = vmul.f32 %v489_v50, %v472_v22 }
 0x688   :  { %v545_v53 = vpack.c.bf16 %v491_v51, %v491_v51 }
 0x68a   :  { %567 = vrot.lane.b32.xlu0 %v545_v53, %s1694_s27 }
 0x6dc   :  { %v549_v32 = vpop.permute.xlu2 %548 }
 0x6dd   :  { %1420 = vmatmul.msk.bf16.vlgmr.msra.gmra.mxu2 %vm70_vm0, %v549_v32  ;;  %1423 = vmatmul.msk.bf16.vlgmr.msrb.gmra.mxu1 %vm70_vm0, %v549_v32 }
 0x6de   :  { %840 = vmatpush.bf16.msra.mxu2 %v1805_v36  ;;  %971 = vmatpush.bf16.msrb.mxu1 %v1805_v36 }
 0x6e2   :  { %841 = vmatpush.bf16.msra.mxu2 %v1814_v38  ;;  %972 = vmatpush.bf16.msrb.mxu1 %v1814_v38 }
 0x6fc   :  { %v568_v54 = vpop.permute.xlu0 %567 }
 0x6fd   :  { %1421 = vmatmul.msk.bf16.vlgmr.msra.gmra.mxu3 %vm70_vm0, %v568_v54  ;;  %v1459_v54 = vld [vmem:[%s2052_s0 + $0x10] sm:$0xff] }
 0x6fe   :  { %893 = vmatpush.bf16.msra.mxu3 %v1767_v2  ;;  %1382 = vmatmul.msk.bf16.gmra.mxu0 %vm115_vm1, %v1459_v54 }
 0x702   :  { %894 = vmatpush.bf16.msra.mxu3 %v1775_v4 }
 0x75a   :  { %v634_v57 = vpop.f32.mrf.mxu1 }
 0x75b   :  { %v638_v58 = vadd.f32 %v634_v57, %v145_v56 }
 0x75d   :  { %1521 = vtanh.f32 %v638_v58  ;;  %v1424_v6 = vmul.f32 -1.442695, %v638_v58 }
 0x760   :  { %v562_v59 = vpop.f32.mrf.mxu2 }
 0x762   :  { %v636_v60 = vpop.f32.mrf.mxu1 }
 0x763   :  { %v1522_v61 = vpop.eup %1521 }
 0x764   :  { %661 = vrot.lane.b32.xlu2 %v1522_v61, %s1690_s17 }
 0x768   :  { %v564_v62 = vpop.f32.mrf.mxu2 }
 0x77b   :  { %v147_v60 = vpop.f32.mrf.mxu0 }
 0x780   :  { %v581_v63 = vpop.f32.mrf.mxu3 }
 0x781   :  { %v582_v0 = vadd.f32 %v581_v63, %v562_v59 }
 0x783   :  { %v585_v1 = vadd.f32 %v1839_v52, %v582_v0  ;;  %v1932_v61 = vpop.f32.mrf.mxu0  ;;  %v148_v0 = vadd.f32 %v1790_v7, %v147_v60 }
 0x785   :  { %1523 = vtanh.f32 %v585_v1  ;;  %v1422_v22 = vmul.f32 -1.442695, %v585_v1 }
 0x786   :  { %1525 = vpow2.f32 %v1424_v6 }
 0x788   :  { %v583_v3 = vpop.f32.mrf.mxu3 }
 0x78b   :  { %v1524_v5 = vpop.eup %1523 }
 0x78c   :  { %608 = vrot.lane.b32.xlu1 %v1524_v5, %s1690_s17  ;;  %v1526_v8 = vpop.eup %1525 }
 0x78d   :  { %v642_v9 = vadd.f32 1.0, %v1526_v8 }
 0x78f   :  { %1527 = vrcp.f32 %v642_v9  ;;  %v654_v15 = vand.u32 2147483648, %v642_v9  ;;  %vm648_vm9 = vweird.f32 %v642_v9  ;;  %v652_v16 = vand.u32 2147483647, %v642_v9 }
 0x790   :  { %1529 = vpow2.f32 %v1422_v22 }
 0x791   :  { %v655_v18 = vor.u32 1.1754944e-38, %v654_v15  ;;  %vm653_vm11 = vcmp.eq.f32.partialorder %v652_v16, 8.507059e+37 }
 0x795   :  { %v1528_v10 = vpop.eup %1527 }
 0x796   :  { %v644_v11 = vmul.f32 %v1528_v10, %v642_v9  ;;  %vm649_vm8 = vweird.f32 %v1528_v10  ;;  %v1530_v23 = vpop.eup %1529 }
 0x797   :  { %vm650_vm10 = vmor %vm648_vm9, %vm649_vm8  ;;  %v589_v24 = vadd.f32 1.0, %v1530_v23 }
 0x798   :  { %v645_v12 = vsub.f32 1.0, %v644_v11 }
 0x799   :  { %1531 = vrcp.f32 %v589_v24  ;;  %v601_v30 = vand.u32 2147483648, %v589_v24  ;;  %vm595_vm13 = vweird.f32 %v589_v24  ;;  %v599_v31 = vand.u32 2147483647, %v589_v24 }
 0x79a   :  { %v646_v13 = vmul.f32 %v1528_v10, %v645_v12 }
 0x79b   :  { %v602_v39 = vor.u32 1.1754944e-38, %v601_v30  ;;  %vm600_vm15 = vcmp.eq.f32.partialorder %v599_v31, 8.507059e+37 }
 0x79c   :  { %v647_v14 = vadd.f32 %v1528_v10, %v646_v13 }
 0x79e   :  { %v651_v17 = vsel %vm650_vm10, %v1528_v10, %v647_v14 }
 0x79f   :  { %v656_v20 = vsel %vm653_vm11, %v655_v18, %v651_v17  ;;  %v1532_v25 = vpop.eup %1531 }
 0x7a0   :  { %v591_v26 = vmul.f32 %v1532_v25, %v589_v24  ;;  %vm596_vm12 = vweird.f32 %v1532_v25  ;;  %v659_v45 = vmul.f32 %v656_v20, %v1877_v43 }
 0x7a1   :  { %vm597_vm14 = vmor %vm595_vm13, %vm596_vm12 }
 0x7a2   :  { %v592_v27 = vsub.f32 1.0, %v591_v26 }
 0x7a4   :  { %v593_v28 = vmul.f32 %v1532_v25, %v592_v27 }
 0x7a6   :  { %v594_v29 = vadd.f32 %v1532_v25, %v593_v28 }
 0x7a8   :  { %v598_v34 = vsel %vm597_vm14, %v1532_v25, %v594_v29 }
 0x7a9   :  { %v603_v42 = vsel %vm600_vm15, %v602_v39, %v598_v34 }
 0x7aa   :  { %v606_v41 = vmul.f32 %v603_v42, %v1881_v47  ;;  %v1460_v47 = vld [vmem:[%s2052_s0 + $0x18] sm:$0xff] }
 0x7ab   :  { %1383 = vmatmul.msk.bf16.gmra.mxu0 %vm115_vm1, %v1460_v47 }
 0x7be   :  { %v662_v19 = vpop.permute.xlu2 %661 }
 0x7bf   :  { %v664_v21 = vmul.f32 %v662_v19, %v656_v20 }
 0x7c1   :  { %666 = vrot.lane.b32.xlu1 %v664_v21, %s1694_s27 }
 0x7fe   :  { %v609_v40 = vpop.permute.xlu1 %608 }
 0x7ff   :  { %v611_v44 = vmul.f32 %v609_v40, %v603_v42 }
 0x801   :  { %613 = vrot.lane.b32.xlu0 %v611_v44, %s1694_s27 }
 0x828   :  { %v1934_v62 = vpop.f32.mrf.mxu0 }
 0x830   :  { %v1936_v63 = vpop.f32.mrf.mxu0 }
 0x833   :  { %v667_v46 = vpop.permute.xlu1 %666 }
 0x834   :  { %v1904_v48 = vadd.f32 %v667_v46, %v659_v45 }
 0x836   :  { %1533 = vtanh.f32 %v1904_v48 }
 0x83c   :  { %v1534_v33 = vpop.eup %1533 }
 0x83d   :  { %672 = vrot.lane.b32.xlu0 %v1534_v33, %s1690_s17 }
 0x873   :  { %v614_v49 = vpop.permute.xlu0 %613 }
 0x874   :  { %v1909_v50 = vadd.f32 %v614_v49, %v606_v41 }
 0x876   :  { %1535 = vtanh.f32 %v1909_v50 }
 0x87c   :  { %v1536_v51 = vpop.eup %1535 }
 0x87d   :  { %619 = vrot.lane.b32.xlu2 %v1536_v51, %s1690_s17 }
 0x8af   :  { %v673_v53 = vpop.permute.xlu0 %672 }
 0x8b0   :  { %v675_v43 = vmul.f32 %v673_v53, %v656_v20 }
 0x8b2   :  { %v677_v32 = vpack.c.bf16 %v675_v43, %v675_v43 }
 0x8b4   :  { %679 = vrot.lane.b32.xlu1 %v677_v32, %s1694_s27 }
 0x8d7   :  { %v620_v55 = vpop.permute.xlu2 %619 }
 0x8d8   :  { %v622_v56 = vmul.f32 %v620_v55, %v603_v42 }
 0x8da   :  { %v676_v57 = vpack.c.bf16 %v622_v56, %v622_v56 }
 0x8dc   :  { %698 = vrot.lane.b32.xlu2 %v676_v57, %s1694_s27 }
 0x926   :  { %v680_v58 = vpop.permute.xlu1 %679 }
 0x927   :  { %1425 = vmatmul.msk.bf16.vlgmr.msrb.gmra.mxu2 %vm70_vm0, %v680_v58  ;;  %1428 = vmatmul.msk.bf16.vlgmr.msrb.gmra.mxu0 %vm70_vm0, %v680_v58 }
 0x928   :  { %1024 = vmatpush.bf16.msrb.mxu2 %v1767_v2  ;;  %1102 = vmatpush.bf16.msrb.mxu0 %v1805_v36 }
 0x92c   :  { %1025 = vmatpush.bf16.msrb.mxu2 %v1775_v4  ;;  %1103 = vmatpush.bf16.msrb.mxu0 %v1814_v38 }
 0x936   :  { %v699_v59 = vpop.permute.xlu2 %698 }
 0x937   :  { %1426 = vmatmul.msk.bf16.vlgmr.msrb.gmra.mxu3 %vm70_vm0, %v699_v59 }
 0x938   :  { %1083 = vmatpush.bf16.msrb.mxu3 %v1803_v35 }
 0x93c   :  { %1084 = vmatpush.bf16.msrb.mxu3 %v1812_v37 }
 0x9a4   :  { %v765_v1 = vpop.f32.mrf.mxu0 }
 0x9a5   :  { %v769_v3 = vadd.f32 %v765_v1, %v148_v0 }
 0x9a7   :  { %1537 = vtanh.f32 %v769_v3  ;;  %v1429_v15 = vmul.f32 -1.442695, %v769_v3 }
 0x9aa   :  { %v693_v5 = vpop.f32.mrf.mxu2 }
 0x9ac   :  { %v767_v6 = vpop.f32.mrf.mxu0 }
 0x9ad   :  { %v1538_v8 = vpop.eup %1537 }
 0x9ae   :  { %792 = vrot.lane.b32.xlu0 %v1538_v8, %s1690_s17 }
 0x9b2   :  { %v695_v9 = vpop.f32.mrf.mxu2 }
 0x9b3   :  { %v150_v9 = vadd.f32 %v1790_v7, %v1932_v61 }
 0x9ba   :  { %v712_v10 = vpop.f32.mrf.mxu3 }
 0x9bb   :  { %v713_v11 = vadd.f32 %v712_v10, %v693_v5 }
 0x9bd   :  { %v716_v12 = vadd.f32 %v1839_v52, %v713_v11 }
 0x9bf   :  { %1539 = vtanh.f32 %v716_v12  ;;  %v1427_v19 = vmul.f32 -1.442695, %v716_v12 }
 0x9c0   :  { %1541 = vpow2.f32 %v1429_v15 }
 0x9c2   :  { %v714_v13 = vpop.f32.mrf.mxu3 }
 0x9c5   :  { %v1540_v14 = vpop.eup %1539 }
 0x9c6   :  { %739 = vrot.lane.b32.xlu1 %v1540_v14, %s1690_s17  ;;  %v1542_v16 = vpop.eup %1541 }
 0x9c7   :  { %v773_v17 = vadd.f32 1.0, %v1542_v16 }
 0x9c9   :  { %1543 = vrcp.f32 %v773_v17  ;;  %v785_v26 = vand.u32 2147483648, %v773_v17  ;;  %vm779_vm2 = vweird.f32 %v773_v17  ;;  %v783_v27 = vand.u32 2147483647, %v773_v17 }
 0x9ca   :  { %1545 = vpow2.f32 %v1427_v19 }
 0x9cb   :  { %v786_v29 = vor.u32 1.1754944e-38, %v785_v26  ;;  %vm784_vm4 = vcmp.eq.f32.partialorder %v783_v27, 8.507059e+37 }
 0x9cf   :  { %v1544_v18 = vpop.eup %1543 }
 0x9d0   :  { %v775_v20 = vmul.f32 %v1544_v18, %v773_v17  ;;  %v1546_v22 = vpop.eup %1545  ;;  %vm780_vm1 = vweird.f32 %v1544_v18 }
 0x9d1   :  { %v720_v24 = vadd.f32 1.0, %v1546_v22  ;;  %vm781_vm3 = vmor %vm779_vm2, %vm780_vm1 }
 0x9d2   :  { %v776_v21 = vsub.f32 1.0, %v775_v20 }
 0x9d3   :  { %1547 = vrcp.f32 %v720_v24  ;;  %v732_v46 = vand.u32 2147483648, %v720_v24  ;;  %vm726_vm6 = vweird.f32 %v720_v24  ;;  %v730_v33 = vand.u32 2147483647, %v720_v24 }
 0x9d4   :  { %v777_v23 = vmul.f32 %v1544_v18, %v776_v21 }
 0x9d5   :  { %v733_v49 = vor.u32 1.1754944e-38, %v732_v46  ;;  %vm731_vm8 = vcmp.eq.f32.partialorder %v730_v33, 8.507059e+37 }
 0x9d6   :  { %v778_v25 = vadd.f32 %v1544_v18, %v777_v23 }
 0x9d8   :  { %v782_v28 = vsel %vm781_vm3, %v1544_v18, %v778_v25 }
 0x9d9   :  { %v787_v31 = vsel %vm784_vm4, %v786_v29, %v782_v28  ;;  %v1548_v39 = vpop.eup %1547 }
 0x9da   :  { %v722_v40 = vmul.f32 %v1548_v39, %v720_v24  ;;  %vm727_vm5 = vweird.f32 %v1548_v39  ;;  %v790_v32 = vmul.f32 %v787_v31, %v1904_v48 }
 0x9db   :  { %vm728_vm7 = vmor %vm726_vm6, %vm727_vm5 }
 0x9dc   :  { %v723_v42 = vsub.f32 1.0, %v722_v40 }
 0x9de   :  { %v724_v44 = vmul.f32 %v1548_v39, %v723_v42 }
 0x9e0   :  { %v725_v45 = vadd.f32 %v1548_v39, %v724_v44 }
 0x9e2   :  { %v729_v41 = vsel %vm728_vm7, %v1548_v39, %v725_v45 }
 0x9e3   :  { %v734_v53 = vsel %vm731_vm8, %v733_v49, %v729_v41 }
 0x9e4   :  { %v737_v56 = vmul.f32 %v734_v53, %v1909_v50 }
 0xa20   :  { %v793_v30 = vpop.permute.xlu0 %792 }
 0xa21   :  { %v795_v34 = vmul.f32 %v793_v30, %v787_v31 }
 0xa23   :  { %797 = vrot.lane.b32.xlu2 %v795_v34, %s1694_s27 }
 0xa38   :  { %v740_v51 = vpop.permute.xlu1 %739 }
 0xa39   :  { %v742_v43 = vmul.f32 %v740_v51, %v734_v53 }
 0xa3b   :  { %744 = vrot.lane.b32.xlu0 %v742_v43, %s1694_s27 }
 0xa7d   :  { %v798_v54 = vpop.permute.xlu2 %797 }
 0xa7e   :  { %v1945_v47 = vadd.f32 %v798_v54, %v790_v32 }
 0xa80   :  { %1549 = vtanh.f32 %v1945_v47 }
 0xa86   :  { %v1550_v55 = vpop.eup %1549 }
 0xa87   :  { %803 = vrot.lane.b32.xlu1 %v1550_v55, %s1690_s17 }
 0xaad   :  { %v745_v57 = vpop.permute.xlu0 %744 }
 0xaae   :  { %v1950_v58 = vadd.f32 %v745_v57, %v737_v56 }
 0xab0   :  { %1551 = vtanh.f32 %v1950_v58 }
 0xab6   :  { %v1552_v59 = vpop.eup %1551 }
 0xab7   :  { %750 = vrot.lane.b32.xlu2 %v1552_v59, %s1690_s17 }
 0xaf9   :  { %v804_v60 = vpop.permute.xlu1 %803 }
 0xafa   :  { %v806_v48 = vmul.f32 %v804_v60, %v787_v31 }
 0xafc   :  { %v808_v0 = vpack.c.bf16 %v806_v48, %v806_v48 }
 0xafe   :  { %810 = vrot.lane.b32.xlu0 %v808_v0, %s1694_s27 }
 0xb11   :  { %v751_v1 = vpop.permute.xlu2 %750 }
 0xb12   :  { %v753_v3 = vmul.f32 %v751_v1, %v734_v53 }
 0xb14   :  { %v807_v5 = vpack.c.bf16 %v753_v3, %v753_v3 }
 0xb16   :  { %829 = vrot.lane.b32.xlu1 %v807_v5, %s1694_s27 }
 0xb70   :  { %v811_v6 = vpop.permute.xlu0 %810 }
 0xb71   :  { %1430 = vmatmul.msk.bf16.vlgmr.msra.gmra.mxu1 %vm70_vm0, %v811_v6  ;;  %1433 = vmatmul.msk.bf16.vlgmr.msra.gmra.mxu3 %vm70_vm0, %v811_v6  ;;  %v1990_v6 = vld [vmem:[%s2054_s2] ss:$0 sm:$0xff] }
 0xb72   :  { %1155 = vmatpush.bf16.msra.mxu1 %v1767_v2  ;;  %1233 = vmatpush.bf16.msra.mxu3 %v1805_v36 }
 0xb76   :  { %1156 = vmatpush.bf16.msra.mxu1 %v1775_v4  ;;  %1234 = vmatpush.bf16.msra.mxu3 %v1814_v38 }
 0xb88   :  { %v830_v50 = vpop.permute.xlu1 %829 }
 0xb89   :  { %1431 = vmatmul.msk.bf16.vlgmr.msra.gmra.mxu2 %vm70_vm0, %v830_v50  ;;  %v153_v50 = vadd.f32 %v1990_v6, %v1934_v62 }
 0xb8a   :  { %1214 = vmatpush.bf16.msra.mxu2 %v1803_v35 }
 0xb8e   :  { %1215 = vmatpush.bf16.msra.mxu2 %v1812_v37 }
 0xbee   :  { %v824_v8 = vpop.f32.mrf.mxu1 }
 0xbf4   :  { %v896_v10 = vpop.f32.mrf.mxu3 }
 0xbf5   :  { %v900_v11 = vadd.f32 %v896_v10, %v150_v9 }
 0xbf6   :  { %v826_v2 = vpop.f32.mrf.mxu1 }
 0xbf7   :  { %1553 = vtanh.f32 %v900_v11  ;;  %v1434_v37 = vmul.f32 -1.442695, %v900_v11 }
 0xbfc   :  { %v898_v36 = vpop.f32.mrf.mxu3 }
 0xbfd   :  { %v1554_v12 = vpop.eup %1553 }
 0xbfe   :  { %923 = vrot.lane.b32.xlu2 %v1554_v12, %s1690_s17 }
 0xc0c   :  { %v843_v4 = vpop.f32.mrf.mxu2 }
 0xc0d   :  { %v844_v38 = vadd.f32 %v843_v4, %v824_v8 }
 0xc0f   :  { %v847_v13 = vadd.f32 %v1839_v52, %v844_v38 }
 0xc11   :  { %1555 = vtanh.f32 %v847_v13  ;;  %v1432_v27 = vmul.f32 -1.442695, %v847_v13 }
 0xc12   :  { %1557 = vpow2.f32 %v1434_v37 }
 0xc14   :  { %v845_v35 = vpop.f32.mrf.mxu2 }
 0xc17   :  { %v1556_v14 = vpop.eup %1555 }
 0xc18   :  { %870 = vrot.lane.b32.xlu0 %v1556_v14, %s1690_s17  ;;  %v1558_v7 = vpop.eup %1557 }
 0xc19   :  { %v904_v61 = vadd.f32 1.0, %v1558_v7 }
 0xc1b   :  { %1559 = vrcp.f32 %v904_v61  ;;  %v916_v20 = vand.u32 2147483648, %v904_v61  ;;  %vm910_vm10 = vweird.f32 %v904_v61  ;;  %v914_v21 = vand.u32 2147483647, %v904_v61 }
 0xc1c   :  { %1561 = vpow2.f32 %v1432_v27 }
 0xc1d   :  { %v917_v23 = vor.u32 1.1754944e-38, %v916_v20  ;;  %vm915_vm12 = vcmp.eq.f32.partialorder %v914_v21, 8.507059e+37 }
 0xc21   :  { %v1560_v15 = vpop.eup %1559 }
 0xc22   :  { %v906_v16 = vmul.f32 %v1560_v15, %v904_v61  ;;  %vm911_vm9 = vweird.f32 %v1560_v15  ;;  %v1562_v28 = vpop.eup %1561 }
 0xc23   :  { %vm912_vm11 = vmor %vm910_vm10, %vm911_vm9  ;;  %v851_v29 = vadd.f32 1.0, %v1562_v28 }
 0xc24   :  { %v907_v17 = vsub.f32 1.0, %v906_v16 }
 0xc25   :  { %1563 = vrcp.f32 %v851_v29  ;;  %v863_v42 = vand.u32 2147483648, %v851_v29  ;;  %vm857_vm14 = vweird.f32 %v851_v29  ;;  %v861_v44 = vand.u32 2147483647, %v851_v29 }
 0xc26   :  { %v908_v18 = vmul.f32 %v1560_v15, %v907_v17 }
 0xc27   :  { %v864_v46 = vor.u32 1.1754944e-38, %v863_v42  ;;  %vm862_vm1 = vcmp.eq.f32.partialorder %v861_v44, 8.507059e+37 }
 0xc28   :  { %v909_v19 = vadd.f32 %v1560_v15, %v908_v18 }
 0xc2a   :  { %v913_v22 = vsel %vm912_vm11, %v1560_v15, %v909_v19 }
 0xc2b   :  { %v918_v24 = vsel %vm915_vm12, %v917_v23, %v913_v22  ;;  %v1564_v30 = vpop.eup %1563 }
 0xc2c   :  { %v853_v31 = vmul.f32 %v1564_v30, %v851_v29  ;;  %vm858_vm13 = vweird.f32 %v1564_v30  ;;  %v921_v51 = vmul.f32 %v918_v24, %v1945_v47 }
 0xc2d   :  { %vm859_vm15 = vmor %vm857_vm14, %vm858_vm13 }
 0xc2e   :  { %v854_v34 = vsub.f32 1.0, %v853_v31 }
 0xc30   :  { %v855_v39 = vmul.f32 %v1564_v30, %v854_v34 }
 0xc32   :  { %v856_v40 = vadd.f32 %v1564_v30, %v855_v39 }
 0xc34   :  { %v860_v45 = vsel %vm859_vm15, %v1564_v30, %v856_v40 }
 0xc35   :  { %v865_v41 = vsel %vm862_vm1, %v864_v46, %v860_v45 }
 0xc36   :  { %v868_v54 = vmul.f32 %v865_v41, %v1950_v58 }
 0xc58   :  { %v924_v25 = vpop.permute.xlu2 %923 }
 0xc59   :  { %v926_v26 = vmul.f32 %v924_v25, %v918_v24 }
 0xc5b   :  { %928 = vrot.lane.b32.xlu1 %v926_v26, %s1694_s27 }
 0xc8a   :  { %v871_v33 = vpop.permute.xlu0 %870 }
 0xc8b   :  { %v873_v49 = vmul.f32 %v871_v33, %v865_v41 }
 0xc8d   :  { %875 = vrot.lane.b32.xlu2 %v873_v49, %s1694_s27 }
 0xccd   :  { %v929_v53 = vpop.permute.xlu1 %928 }
 0xcce   :  { %v1973_v43 = vadd.f32 %v929_v53, %v921_v51 }
 0xcd0   :  { %1565 = vtanh.f32 %v1973_v43 }
 0xcd6   :  { %v1566_v32 = vpop.eup %1565 }
 0xcd7   :  { %934 = vrot.lane.b32.xlu0 %v1566_v32, %s1690_s17 }
 0xce7   :  { %v876_v55 = vpop.permute.xlu2 %875 }
 0xce8   :  { %v1978_v56 = vadd.f32 %v876_v55, %v868_v54 }
 0xcea   :  { %1567 = vtanh.f32 %v1978_v56 }
 0xcf0   :  { %v1568_v57 = vpop.eup %1567 }
 0xcf1   :  { %881 = vrot.lane.b32.xlu1 %v1568_v57, %s1690_s17 }
 0xd49   :  { %v935_v59 = vpop.permute.xlu0 %934 }
 0xd4a   :  { %v937_v47 = vmul.f32 %v935_v59, %v918_v24 }
 0xd4c   :  { %v939_v60 = vpack.c.bf16 %v937_v47, %v937_v47 }
 0xd4e   :  { %941 = vrot.lane.b32.xlu2 %v939_v60, %s1694_s27 }
 0xd63   :  { %v882_v48 = vpop.permute.xlu1 %881 }
 0xd64   :  { %v884_v0 = vmul.f32 %v882_v48, %v865_v41 }
 0xd66   :  { %v938_v1 = vpack.c.bf16 %v884_v0, %v884_v0  ;;  %v155_v0 = vadd.f32 %v1990_v6, %v1936_v63 }
 0xd68   :  { %960 = vrot.lane.b32.xlu0 %v938_v1, %s1694_s27 }
 0xda8   :  { %v942_v3 = vpop.permute.xlu2 %941 }
 0xda9   :  { %1435 = vmatmul.msk.bf16.vlgmr.msra.gmra.mxu0 %vm70_vm0, %v942_v3  ;;  %1438 = vmatmul.msk.bf16.vlgmr.msrb.gmra.mxu2 %vm70_vm0, %v942_v3 }
 0xdda   :  { %v961_v58 = vpop.permute.xlu0 %960 }
 0xddb   :  { %1436 = vmatmul.msk.bf16.vlgmr.msrb.gmra.mxu1 %vm70_vm0, %v961_v58 }
 0xe26   :  { %v955_v5 = vpop.f32.mrf.mxu0 }
 0xe2c   :  { %v1027_v8 = vpop.f32.mrf.mxu2 }
 0xe2d   :  { %v1031_v9 = vadd.f32 %v1027_v8, %v153_v50 }
 0xe2e   :  { %v957_v10 = vpop.f32.mrf.mxu0 }
 0xe2f   :  { %1569 = vtanh.f32 %v1031_v9  ;;  %v1439_v35 = vmul.f32 -1.442695, %v1031_v9 }
 0xe34   :  { %v1029_v11 = vpop.f32.mrf.mxu2 }
 0xe35   :  { %v1570_v2 = vpop.eup %1569  ;;  %v2020_v11 = vld [vmem:[%s2058_s6] ss:$0 sm:$0xff]  ;;  %s1695_s6 = smov 96  }
 0xe36   :  { %1054 = vrot.lane.b32.xlu1 %v1570_v2, %s1690_s17 }
 0xe58   :  { %v974_v36 = vpop.f32.mrf.mxu1 }
 0xe59   :  { %v975_v12 = vadd.f32 %v974_v36, %v955_v5 }
 0xe5b   :  { %v978_v4 = vadd.f32 %v1839_v52, %v975_v12 }
 0xe5d   :  { %1571 = vtanh.f32 %v978_v4  ;;  %v1437_v37 = vmul.f32 -1.442695, %v978_v4 }
 0xe5e   :  { %1573 = vpow2.f32 %v1439_v35 }
 0xe60   :  { %v976_v38 = vpop.f32.mrf.mxu1 }
 0xe63   :  { %v1572_v13 = vpop.eup %1571 }
 0xe64   :  { %1001 = vrot.lane.b32.xlu2 %v1572_v13, %s1690_s17  ;;  %v1574_v62 = vpop.eup %1573 }
 0xe65   :  { %v1035_v14 = vadd.f32 1.0, %v1574_v62 }
 0xe67   :  { %1575 = vrcp.f32 %v1035_v14  ;;  %v1047_v52 = vand.u32 2147483648, %v1035_v14  ;;  %vm1041_vm3 = vweird.f32 %v1035_v14  ;;  %v1045_v20 = vand.u32 2147483647, %v1035_v14 }
 0xe68   :  { %1577 = vpow2.f32 %v1437_v37 }
 0xe69   :  { %v1048_v22 = vor.u32 1.1754944e-38, %v1047_v52  ;;  %vm1046_vm5 = vcmp.eq.f32.partialorder %v1045_v20, 8.507059e+37 }
 0xe6d   :  { %v1576_v7 = vpop.eup %1575 }
 0xe6e   :  { %v1037_v61 = vmul.f32 %v1576_v7, %v1035_v14  ;;  %v1578_v16 = vpop.eup %1577  ;;  %vm1042_vm2 = vweird.f32 %v1576_v7 }
 0xe6f   :  { %v982_v18 = vadd.f32 1.0, %v1578_v16  ;;  %vm1043_vm4 = vmor %vm1041_vm3, %vm1042_vm2 }
 0xe70   :  { %v1038_v15 = vsub.f32 1.0, %v1037_v61 }
 0xe71   :  { %1579 = vrcp.f32 %v982_v18  ;;  %v994_v31 = vand.u32 2147483648, %v982_v18  ;;  %vm988_vm7 = vweird.f32 %v982_v18  ;;  %v992_v34 = vand.u32 2147483647, %v982_v18 }
 0xe72   :  { %v1039_v17 = vmul.f32 %v1576_v7, %v1038_v15 }
 0xe73   :  { %v995_v40 = vor.u32 1.1754944e-38, %v994_v31  ;;  %vm993_vm9 = vcmp.eq.f32.partialorder %v992_v34, 8.507059e+37 }
 0xe74   :  { %v1040_v19 = vadd.f32 %v1576_v7, %v1039_v17 }
 0xe76   :  { %v1044_v21 = vsel %vm1043_vm4, %v1576_v7, %v1040_v19 }
 0xe77   :  { %v1580_v23 = vpop.eup %1579  ;;  %v1049_v24 = vsel %vm1046_vm5, %v1048_v22, %v1044_v21 }
 0xe78   :  { %v984_v27 = vmul.f32 %v1580_v23, %v982_v18  ;;  %vm989_vm6 = vweird.f32 %v1580_v23  ;;  %v1052_v46 = vmul.f32 %v1049_v24, %v1973_v43 }
 0xe79   :  { %vm990_vm8 = vmor %vm988_vm7, %vm989_vm6 }
 0xe7a   :  { %v985_v28 = vsub.f32 1.0, %v984_v27 }
 0xe7c   :  { %v986_v29 = vmul.f32 %v1580_v23, %v985_v28 }
 0xe7e   :  { %v987_v30 = vadd.f32 %v1580_v23, %v986_v29 }
 0xe80   :  { %v991_v39 = vsel %vm990_vm8, %v1580_v23, %v987_v30 }
 0xe81   :  { %v996_v44 = vsel %vm993_vm9, %v995_v40, %v991_v39 }
 0xe82   :  { %v999_v51 = vmul.f32 %v996_v44, %v1978_v56 }
 0xea8   :  { %v1055_v25 = vpop.permute.xlu1 %1054 }
 0xea9   :  { %v1057_v26 = vmul.f32 %v1055_v25, %v1049_v24 }
 0xeab   :  { %1059 = vrot.lane.b32.xlu0 %v1057_v26, %s1694_s27 }
 0xebe   :  { %v1002_v42 = vpop.permute.xlu2 %1001 }
 0xebf   :  { %v1004_v45 = vmul.f32 %v1002_v42, %v996_v44 }
 0xec1   :  { %1006 = vrot.lane.b32.xlu1 %v1004_v45, %s1694_s27 }
 0xf1d   :  { %v1060_v33 = vpop.permute.xlu0 %1059 }
 0xf1e   :  { %v2000_v41 = vadd.f32 %v1060_v33, %v1052_v46 }
 0xf20   :  { %1581 = vtanh.f32 %v2000_v41 }
 0xf26   :  { %v1582_v49 = vpop.eup %1581 }
 0xf27   :  { %1065 = vrot.lane.b32.xlu2 %v1582_v49, %s1690_s17 }
 0xf33   :  { %v1007_v53 = vpop.permute.xlu1 %1006 }
 0xf34   :  { %v2005_v32 = vadd.f32 %v1007_v53, %v999_v51 }
 0xf36   :  { %1583 = vtanh.f32 %v2005_v32 }
 0xf3c   :  { %v1584_v54 = vpop.eup %1583 }
 0xf3d   :  { %1012 = vrot.lane.b32.xlu0 %v1584_v54, %s1690_s17 }
 0xf81   :  { %v1066_v55 = vpop.permute.xlu2 %1065 }
 0xf82   :  { %v1068_v43 = vmul.f32 %v1066_v55, %v1049_v24 }
 0xf84   :  { %v1070_v57 = vpack.c.bf16 %v1068_v43, %v1068_v43 }
 0xf86   :  { %1072 = vrot.lane.b32.xlu1 %v1070_v57, %s1694_s27 }
 0xfaf   :  { %v1013_v59 = vpop.permute.xlu0 %1012 }
 0xfb0   :  { %v1015_v47 = vmul.f32 %v1013_v59, %v996_v44 }
 0xfb2   :  { %v1069_v60 = vpack.c.bf16 %v1015_v47, %v1015_v47 }
 0xfb4   :  { %1091 = vrot.lane.b32.xlu2 %v1069_v60, %s1694_s27 }
 0xff8   :  { %v1073_v48 = vpop.permute.xlu1 %1072 }
 0xff9   :  { %1440 = vmatmul.msk.bf16.vlgmr.msrb.gmra.mxu3 %vm70_vm0, %v1073_v48  ;;  %1443 = vmatmul.msk.bf16.vlgmr.msra.gmra.mxu1 %vm70_vm0, %v1073_v48 }
0x100e   :  { %v1092_v56 = vpop.permute.xlu2 %1091 }
0x100f   :  { %1441 = vmatmul.msk.bf16.vlgmr.msrb.gmra.mxu0 %vm70_vm0, %v1092_v56 }
0x1076   :  { %v1158_v1 = vpop.f32.mrf.mxu1 }
0x1077   :  { %v1162_v3 = vadd.f32 %v1158_v1, %v155_v0 }
0x1079   :  { %1585 = vtanh.f32 %v1162_v3  ;;  %v1444_v36 = vmul.f32 -1.442695, %v1162_v3 }
0x107c   :  { %v1086_v58 = vpop.f32.mrf.mxu3 }
0x107e   :  { %v1160_v5 = vpop.f32.mrf.mxu1 }
0x107f   :  { %v1586_v50 = vpop.eup %1585 }
0x1080   :  { %1185 = vrot.lane.b32.xlu1 %v1586_v50, %s1690_s17 }
0x1084   :  { %v1088_v8 = vpop.f32.mrf.mxu3 }
0x108c   :  { %v1105_v9 = vpop.f32.mrf.mxu0 }
0x108d   :  { %v1106_v10 = vadd.f32 %v1105_v9, %v1086_v58 }
0x108f   :  { %v1109_v2 = vadd.f32 %v2020_v11, %v1106_v10 }
0x1091   :  { %1587 = vtanh.f32 %v1109_v2  ;;  %v1442_v13 = vmul.f32 -1.442695, %v1109_v2 }
0x1092   :  { %1589 = vpow2.f32 %v1444_v36 }
0x1094   :  { %v1107_v63 = vpop.f32.mrf.mxu0 }
0x1097   :  { %v1588_v6 = vpop.eup %1587 }
0x1098   :  { %1132 = vrot.lane.b32.xlu0 %v1588_v6, %s1690_s17  ;;  %v1590_v12 = vpop.eup %1589 }
0x1099   :  { %v1166_v4 = vadd.f32 1.0, %v1590_v12 }
0x109b   :  { %1591 = vrcp.f32 %v1166_v4  ;;  %v1178_v15 = vand.u32 2147483648, %v1166_v4  ;;  %vm1172_vm11 = vweird.f32 %v1166_v4  ;;  %v1176_v16 = vand.u32 2147483647, %v1166_v4 }
0x109c   :  { %1593 = vpow2.f32 %v1442_v13 }
0x109d   :  { %v1179_v18 = vor.u32 1.1754944e-38, %v1178_v15  ;;  %vm1177_vm13 = vcmp.eq.f32.partialorder %v1176_v16, 8.507059e+37 }
0x10a1   :  { %v1592_v38 = vpop.eup %1591 }
0x10a2   :  { %v1168_v35 = vmul.f32 %v1592_v38, %v1166_v4  ;;  %v1594_v14 = vpop.eup %1593  ;;  %vm1173_vm10 = vweird.f32 %v1592_v38 }
0x10a3   :  { %v1113_v7 = vadd.f32 1.0, %v1594_v14  ;;  %vm1174_vm12 = vmor %vm1172_vm11, %vm1173_vm10 }
0x10a4   :  { %v1169_v62 = vsub.f32 1.0, %v1168_v35 }
0x10a5   :  { %1595 = vrcp.f32 %v1113_v7  ;;  %v1125_v26 = vand.u32 2147483648, %v1113_v7  ;;  %vm1119_vm15 = vweird.f32 %v1113_v7  ;;  %v1123_v27 = vand.u32 2147483647, %v1113_v7 }
0x10a6   :  { %v1170_v37 = vmul.f32 %v1592_v38, %v1169_v62 }
0x10a7   :  { %v1126_v29 = vor.u32 1.1754944e-38, %v1125_v26  ;;  %vm1124_vm2 = vcmp.eq.f32.partialorder %v1123_v27, 8.507059e+37 }
0x10a8   :  { %v1171_v61 = vadd.f32 %v1592_v38, %v1170_v37 }
0x10aa   :  { %v1175_v17 = vsel %vm1174_vm12, %v1592_v38, %v1171_v61  ;;  %v1468_v61 = vld [vmem:[#allocation10] sm:$0xff] }
0x10ab   :  { %v1180_v52 = vsel %vm1177_vm13, %v1179_v18, %v1175_v17  ;;  %v1596_v21 = vpop.eup %1595 }
0x10ac   :  { %v1115_v22 = vmul.f32 %v1596_v21, %v1113_v7  ;;  %vm1120_vm14 = vweird.f32 %v1596_v21  ;;  %v1183_v39 = vmul.f32 %v1180_v52, %v2000_v41  ;;  %v1469_v7 = vld [vmem:[#allocation10 + $0x8] sm:$0xff] }
0x10ad   :  { %vm1121_vm1 = vmor %vm1119_vm15, %vm1120_vm14  ;;  %1334 = vmatpush.bf16.msra.mxu0 %v1469_v7 }
0x10ae   :  { %v1116_v23 = vsub.f32 1.0, %v1115_v22 }
0x10b0   :  { %v1117_v24 = vmul.f32 %v1596_v21, %v1116_v23 }
0x10b1   :  { %1335 = vmatpush.bf16.msra.mxu0 %v1468_v61 }
0x10b2   :  { %v1118_v25 = vadd.f32 %v1596_v21, %v1117_v24 }
0x10b4   :  { %v1122_v28 = vsel %vm1121_vm1, %v1596_v21, %v1118_v25  ;;  %v1480_v21 = vld [vmem:[%s2060_s8] ss:$0 sm:$0xff] }
0x10b5   :  { %v1127_v31 = vsel %vm1124_vm2, %v1126_v29, %v1122_v28 }
0x10b6   :  { %v1130_v40 = vmul.f32 %v1127_v31, %v2005_v32 }
0x10f2   :  { %v1186_v19 = vpop.permute.xlu1 %1185 }
0x10f3   :  { %v1188_v20 = vmul.f32 %v1186_v19, %v1180_v52 }
0x10f5   :  { %1190 = vrot.lane.b32.xlu0 %v1188_v20, %s1694_s27 }
0x110a   :  { %v1133_v30 = vpop.permute.xlu0 %1132 }
0x110b   :  { %v1135_v34 = vmul.f32 %v1133_v30, %v1127_v31 }
0x110d   :  { %1137 = vrot.lane.b32.xlu2 %v1135_v34, %s1694_s27 }
0x1167   :  { %v1191_v42 = vpop.permute.xlu0 %1190  ;;  %v1138_v44 = vpop.permute.xlu2 %1137 }
0x1168   :  { %v1193_v45 = vadd.f32 %v1191_v42, %v1183_v39  ;;  %v1140_v46 = vadd.f32 %v1138_v44, %v1130_v40 }
0x116a   :  { %1597 = vtanh.f32 %v1193_v45 }
0x116b   :  { %1599 = vtanh.f32 %v1140_v46 }
0x1170   :  { %v1598_v33 = vpop.eup %1597 }
0x1171   :  { %v1600_v49 = vpop.eup %1599  ;;  %1196 = vrot.lane.b32.xlu2 %v1598_v33, %s1690_s17 }
0x1172   :  { %1143 = vrot.lane.b32.xlu1 %v1600_v49, %s1690_s17 }
0x11cb   :  { %v1197_v51 = vpop.permute.xlu2 %1196 }
0x11cc   :  { %v1199_v53 = vmul.f32 %v1197_v51, %v1180_v52 }
0x11ce   :  { %v1201_v54 = vpack.c.bf16 %v1199_v53, %v1199_v53 }
0x11d0   :  { %1203 = vrot.lane.b32.xlu0 %v1201_v54, %s1694_s27 }
0x11e4   :  { %v1144_v41 = vpop.permute.xlu1 %1143 }
0x11e5   :  { %v1146_v55 = vmul.f32 %v1144_v41, %v1127_v31 }
0x11e7   :  { %v1200_v32 = vpack.c.bf16 %v1146_v55, %v1146_v55 }
0x11e9   :  { %1222 = vrot.lane.b32.xlu1 %v1200_v32, %s1694_s27 }
0x1242   :  { %v1204_v43 = vpop.permute.xlu0 %1203 }
0x1243   :  { %1445 = vmatmul.msk.bf16.vlgmr.msra.gmra.mxu2 %vm70_vm0, %v1204_v43 }
0x125b   :  { %v1223_v57 = vpop.permute.xlu1 %1222 }
0x125c   :  { %1446 = vmatmul.msk.bf16.vlgmr.msra.gmra.mxu3 %vm70_vm0, %v1223_v57 }
0x12c6   :  { %v1217_v59 = vpop.f32.mrf.mxu2 }
0x12ce   :  { %v1219_v47 = vpop.f32.mrf.mxu2 }
0x12df   :  { %v1236_v60 = vpop.f32.mrf.mxu3 }
0x12e0   :  { %v1237_v48 = vadd.f32 %v1236_v60, %v1217_v59 }
0x12e2   :  { %v1240_v56 = vadd.f32 %v2020_v11, %v1237_v48 }
0x12e4   :  { %1601 = vtanh.f32 %v1240_v56  ;;  %v1447_v3 = vmul.f32 -1.442695, %v1240_v56 }
0x12e6   :  { %1603 = vpow2.f32 %v1447_v3 }
0x12e7   :  { %v1238_v0 = vpop.f32.mrf.mxu3 }
0x12ea   :  { %v1602_v1 = vpop.eup %1601 }
0x12eb   :  { %1263 = vrot.lane.b32.xlu2 %v1602_v1, %s1690_s17 }
0x12ec   :  { %v1604_v58 = vpop.eup %1603 }
0x12ed   :  { %v1244_v5 = vadd.f32 1.0, %v1604_v58 }
0x12ef   :  { %1605 = vrcp.f32 %v1244_v5  ;;  %v1256_v63 = vand.u32 2147483648, %v1244_v5  ;;  %vm1250_vm4 = vweird.f32 %v1244_v5  ;;  %v1254_v6 = vand.u32 2147483647, %v1244_v5 }
0x12f1   :  { %v1257_v36 = vor.u32 1.1754944e-38, %v1256_v63  ;;  %vm1255_vm6 = vcmp.eq.f32.partialorder %v1254_v6, 8.507059e+37 }
0x12f5   :  { %v1606_v50 = vpop.eup %1605 }
0x12f6   :  { %v1246_v8 = vmul.f32 %v1606_v50, %v1244_v5  ;;  %vm1251_vm3 = vweird.f32 %v1606_v50 }
0x12f7   :  { %vm1252_vm5 = vmor %vm1250_vm4, %vm1251_vm3 }
0x12f8   :  { %v1247_v9 = vsub.f32 1.0, %v1246_v8 }
0x12fa   :  { %v1248_v10 = vmul.f32 %v1606_v50, %v1247_v9 }
0x12fc   :  { %v1249_v2 = vadd.f32 %v1606_v50, %v1248_v10 }
0x12fe   :  { %v1253_v11 = vsel %vm1252_vm5, %v1606_v50, %v1249_v2 }
0x12ff   :  { %v1258_v4 = vsel %vm1255_vm6, %v1257_v36, %v1253_v11 }
0x1300   :  { %v1261_v13 = vmul.f32 %v1258_v4, %v1140_v46 }
0x1345   :  { %v1264_v12 = vpop.permute.xlu2 %1263 }
0x1346   :  { %v1266_v38 = vmul.f32 %v1264_v12, %v1258_v4 }
0x1348   :  { %1268 = vrot.lane.b32.xlu0 %v1266_v38, %s1694_s27 }
0x1350   :  { %1279 = vrot.lane.b32.xlu0 %v1199_v53, %s1694_s27 }
0x13ba   :  { %v1269_v35 = vpop.permute.xlu0 %1268 }
0x13bb   :  { %v1271_v62 = vadd.f32 %v1269_v35, %v1261_v13 }
0x13bd   :  { %1607 = vtanh.f32 %v1271_v62  ;;  %1294 = vrot.lane.b32.xlu0 %v1271_v62, %s1695_s6 }
0x13c2   :  { %v1280_v14 = vpop.permute.xlu0 %1279 }
0x13c3   :  { %v1608_v37 = vpop.eup %1607  ;;  %1282 = vst.msk [vmem:[#allocation3] sm:$0xff] %vm70_vm0, %v1280_v14 }
0x13c4   :  { %1274 = vrot.lane.b32.xlu1 %v1608_v37, %s1690_s17 }
0x13cc   :  { %1284 = vrot.lane.b32.xlu1 %v1193_v45, %s1695_s6 }
0x142f   :  { %v1295_v15 = vpop.permute.xlu0 %1294 }
0x1430   :  { %1297 = vst.msk [vmem:[#allocation6] sm:$0xff] %vm70_vm0, %v1295_v15 }
0x1436   :  { %v1275_v16 = vpop.permute.xlu1 %1274 }
0x1437   :  { %v1277_v17 = vmul.f32 %v1275_v16, %v1258_v4 }
0x1439   :  { %v1301_v18 = vpack.c.bf16 %v1277_v17, %v1277_v17 }
0x143b   :  { %1311 = vrot.lane.b32.xlu2 %v1301_v18, %s1694_s27 }
0x143e   :  { %v1285_v19 = vpop.permute.xlu1 %1284 }
0x143f   :  { %1287 = vst.msk [vmem:[#allocation4] sm:$0xff] %vm70_vm0, %v1285_v19 }
0x1443   :  { %1289 = vrot.lane.b32.xlu2 %v1277_v17, %s1694_s27 }
0x1495   :  { %v1312_v52 = vpop.permute.xlu2 %1311 }
0x1496   :  { %1456 = vmatmul.msk.bf16.vlgmr.msra.gmra.mxu0 %vm70_vm0, %v1312_v52 }
0x149d   :  { %v1290_v20 = vpop.permute.xlu2 %1289 }
0x149e   :  { %1292 = vst.msk [vmem:[#allocation5] sm:$0xff] %vm70_vm0, %v1290_v20 }
0x1513   :  { %v1337_v22 = vpop.f32.mrf.mxu0 }
0x1514   :  { %v1338_v23 = vadd.f32 %v1480_v21, %v1337_v22 }
0x1516   :  { %1341 = vst [vmem:[#allocation12] sm:$0xff] %v1338_v23 }
0x1517   :  { %1352 = dma.vmem_to_hbm [thread:$0]  %s1348_s21, 128, %s1350_s24, [#allocation9]  }
0x151b   :  { %v1339_v24 = vpop.f32.mrf.mxu0 }
0x151c   :  { %1687 = dma.done.wait [#allocation9], 128  }
0x151d   :  { %1688 = vsyncadd [#allocation9], 4294967168 }
0x151e   :  { %1357 = vsyncpa [#allocation8], 1 }
0x151f   :  { %1358 = vsyncpa [#allocation11], 1 }
0x1520   :  { %1359 = vsyncpa [#allocation9], 1 }

</bundles_post_ra>
